<compile_context>
chip_gen: v6e
topology: v6e:2x2x1
jax: 0.10.0
libtpu: 0.0.40
codegen_flags: <defaults>
</compile_context>

<pallas_src>
import functools
import math

import jax
import jax.numpy as jnp
from jax.experimental import pallas as pl
from jax.experimental.pallas import tpu as pltpu

LEAKY_SLOPE = 0.01   # nn.LeakyReLU default negative_slope
BN_EPS = 1e-5        # nn.BatchNorm1d default eps
LANE = 128           # TPU lane width


def _round_up(n, m):
    return ((n + m - 1) // m) * m


def autoencoder_kernel(num_layers, num_encoder_layers, *refs):
    """Whole forward pass in one kernel invocation (all operands resident in VMEM).

    refs = (x_ref,
            [w(bf16), b(f32), gamma(f32), beta(f32)] per Linear+BN+LeakyReLU layer,
            [w(bf16), b(f32)]                         for the final Linear+LeakyReLU,
            enc_out_ref, dec_out_ref)
    All feature dims are pre-padded to multiples of 128 lanes in the wrapper.
    """
    enc_out_ref, dec_out_ref = refs[-2], refs[-1]
    x_ref = refs[0]
    p = refs[1:-2]

    h = x_ref[...].astype(jnp.float32)
    pi = 0
    for layer in range(num_layers):
        is_last = layer == num_layers - 1
        w = p[pi][...]        # bf16 (fin_pad, fout_pad)
        b = p[pi + 1][...]    # f32  (1, fout_pad)
        pi += 2

        # Linear on the MXU: bf16 operands, f32 accumulation.
        y = jnp.dot(h.astype(jnp.bfloat16), w,
                    preferred_element_type=jnp.float32) + b

        if not is_last:
            # BatchNorm1d (training mode: batch statistics, biased variance),
            # folded into a fused per-feature scale/shift. Elementwise math in f32.
            gamma = p[pi][...]
            beta = p[pi + 1][...]
            pi += 2
            mean = jnp.mean(y, axis=0, keepdims=True)
            var = jnp.mean(jnp.square(y - mean), axis=0, keepdims=True)
            scale = gamma * jax.lax.rsqrt(var + BN_EPS)   # rsqrt -> EUP slot
            shift = beta - mean * scale
            y = y * scale + shift

        # LeakyReLU (f32)
        h = jnp.where(y >= 0.0, y, LEAKY_SLOPE * y)

        if layer == num_encoder_layers - 1:
            enc_out_ref[...] = h.astype(enc_out_ref.dtype)

    dec_out_ref[...] = h.astype(dec_out_ref.dtype)


def init_autoencoder_params(key, in_channels, latent_dim=30, hidden_dims=None):
    """Deterministic parameter init matching the module's __init__ shapes.

    Weights are zero-padded to lane multiples (128) on both feature axes and stored
    in bf16; biases/gamma/beta are padded on the feature axis and kept in f32.
    Zero-padded rows/cols contribute exactly 0 to the matmul, padded BN columns stay 0
    through normalize+affine+LeakyReLU, so padding never leaks into real features.
    """
    if hidden_dims is None:
        hidden_dims = [512, 256, 128, latent_dim]
    enc_dims = list(hidden_dims)
    dec_dims = list(reversed(hidden_dims))

    # (fan_in, fan_out) for every Linear in order of application.
    layer_dims = []
    c = in_channels
    for h in enc_dims:
        layer_dims.append((c, h))
        c = h
    for i in range(len(dec_dims) - 1):
        layer_dims.append((dec_dims[i], dec_dims[i + 1]))
    layer_dims.append((dec_dims[-1], in_channels))  # final Linear, no BN

    params = []
    for li, (fin, fout) in enumerate(layer_dims):
        key, k_w, k_b, k_g, k_bt = jax.random.split(key, 5)
        fin_p, fout_p = _round_up(fin, LANE), _round_up(fout, LANE)
        bound = 1.0 / (fin ** 0.5)  # PyTorch Linear default init range
        w = jax.random.uniform(k_w, (fin, fout), jnp.float32, -bound, bound)
        b = jax.random.uniform(k_b, (1, fout), jnp.float32, -bound, bound)
        w = jnp.pad(w, ((0, fin_p - fin), (0, fout_p - fout)))
        b = jnp.pad(b, ((0, 0), (0, fout_p - fout)))
        params += [w.astype(jnp.bfloat16), b]       # bf16 weights: halve weight DMA
        if li != len(layer_dims) - 1:
            gamma = 1.0 + 0.01 * jax.random.normal(k_g, (1, fout), jnp.float32)
            beta = 0.01 * jax.random.normal(k_bt, (1, fout), jnp.float32)
            gamma = jnp.pad(gamma, ((0, 0), (0, fout_p - fout)), constant_values=1.0)
            beta = jnp.pad(beta, ((0, 0), (0, fout_p - fout)))
            params += [gamma, beta]

    return params, len(enc_dims), len(layer_dims)


def _vmem_limit_bytes(arrays, out_shapes):
    """Actual footprint of inputs/outputs plus headroom; never the full physical VMEM."""
    total = 0
    for a in arrays:
        total += a.size * a.dtype.itemsize
    for s in out_shapes:
        total += math.prod(s.shape) * jnp.dtype(s.dtype).itemsize
    # 2x for intermediate activations / compiler temporaries, plus fixed headroom,
    # clamped to [8 MiB, 32 MiB] (safe on v7x's 64 MiB per-TC VMEM).
    return int(min(max(2 * total + (4 << 20), 8 << 20), 32 << 20))


def autoencoder_forward(x, params, num_layers, num_encoder_layers,
                        latent_dim, in_channels):
    B = x.shape[0]
    c_pad = _round_up(in_channels, LANE)
    l_pad = _round_up(latent_dim, LANE)

    # Lane-pad the input; padded columns multiply zero weight rows -> no effect.
    x_pad = jnp.pad(x, ((0, 0), (0, c_pad - in_channels)))

    out_shapes = (
        jax.ShapeDtypeStruct((B, l_pad), jnp.float32),
        jax.ShapeDtypeStruct((B, c_pad), jnp.float32),
    )

    kernel = functools.partial(autoencoder_kernel, num_layers, num_encoder_layers)
    vmem = pl.BlockSpec(memory_space=pltpu.MemorySpace.VMEM)
    enc_pad, dec_pad = pl.pallas_call(
        kernel,
        out_shape=out_shapes,
        in_specs=[vmem] * (1 + len(params)),
        out_specs=(vmem, vmem),
        compiler_params=pltpu.CompilerParams(
            vmem_limit_bytes=_vmem_limit_bytes([x_pad, *params], out_shapes)),
    )(x_pad, *params)

    # Mirrors forward(): return [x, encoder_out, decoder_out] (unpadded views).
    return [x, enc_pad[:, :latent_dim], dec_pad[:, :in_channels]]


def _reference_forward(x_pad, params, num_layers, num_encoder_layers):
    """Pure-JAX reference mirroring the PyTorch module (same bf16 matmul operands)."""
    h = x_pad.astype(jnp.float32)
    pi = 0
    enc_out = None
    for layer in range(num_layers):
        is_last = layer == num_layers - 1
        w, b = params[pi], params[pi + 1]
        pi += 2
        y = jnp.dot(h.astype(jnp.bfloat16), w,
                    preferred_element_type=jnp.float32) + b
        if not is_last:
            gamma, beta = params[pi], params[pi + 1]
            pi += 2
            mean = jnp.mean(y, axis=0, keepdims=True)
            var = jnp.mean(jnp.square(y - mean), axis=0, keepdims=True)
            y = (y - mean) * jax.lax.rsqrt(var + BN_EPS) * gamma + beta
        h = jnp.where(y >= 0.0, y, LEAKY_SLOPE * y)
        if layer == num_encoder_layers - 1:
            enc_out = h
    return enc_out, h


if __name__ == "__main__":
    # Small, deterministic example consistent with the module: x is (batch, in_channels).
    batch = 8
    in_channels = 64
    latent_dim = 30  # module default

    key = jax.random.PRNGKey(0)
    key, k_x, k_p = jax.random.split(key, 3)
    x = jax.random.normal(k_x, (batch, in_channels), jnp.float32)

    params, num_encoder_layers, num_layers = init_autoencoder_params(
        k_p, in_channels, latent_dim=latent_dim, hidden_dims=None
    )

    out = autoencoder_forward(x, params, num_layers, num_encoder_layers,
                              latent_dim, in_channels)
    out = jax.block_until_ready(out)
    x_out, enc_out, dec_out = out

    assert x_out.shape == (batch, in_channels)
    assert enc_out.shape == (batch, latent_dim)
    assert dec_out.shape == (batch, in_channels)

    # Cross-check against a pure-JAX reference using the same bf16 matmul operands.
    c_pad = _round_up(in_channels, LANE)
    x_pad = jnp.pad(x, ((0, 0), (0, c_pad - in_channels)))
    ref_enc_pad, ref_dec_pad = _reference_forward(
        x_pad, params, num_layers, num_encoder_layers)
    ref_enc = ref_enc_pad[:, :latent_dim]
    ref_dec = ref_dec_pad[:, :in_channels]
    assert jnp.allclose(enc_out, ref_enc, rtol=5e-3, atol=5e-3)
    assert jnp.allclose(dec_out, ref_dec, rtol=5e-3, atol=5e-3)

    print("KERNEL_OK")
</pallas_src>

<mosaic_0001>
module attributes {stable_mosaic.version = 11 : i64} {
  func.func @autoencoder_kernel(%arg0: memref<8x128xf32, #tpu.memory_space<vmem>>, %arg1: memref<128x512xbf16, #tpu.memory_space<vmem>>, %arg2: memref<1x512xf32, #tpu.memory_space<vmem>>, %arg3: memref<1x512xf32, #tpu.memory_space<vmem>>, %arg4: memref<1x512xf32, #tpu.memory_space<vmem>>, %arg5: memref<512x256xbf16, #tpu.memory_space<vmem>>, %arg6: memref<1x256xf32, #tpu.memory_space<vmem>>, %arg7: memref<1x256xf32, #tpu.memory_space<vmem>>, %arg8: memref<1x256xf32, #tpu.memory_space<vmem>>, %arg9: memref<256x128xbf16, #tpu.memory_space<vmem>>, %arg10: memref<1x128xf32, #tpu.memory_space<vmem>>, %arg11: memref<1x128xf32, #tpu.memory_space<vmem>>, %arg12: memref<1x128xf32, #tpu.memory_space<vmem>>, %arg13: memref<128x128xbf16, #tpu.memory_space<vmem>>, %arg14: memref<1x128xf32, #tpu.memory_space<vmem>>, %arg15: memref<1x128xf32, #tpu.memory_space<vmem>>, %arg16: memref<1x128xf32, #tpu.memory_space<vmem>>, %arg17: memref<128x128xbf16, #tpu.memory_space<vmem>>, %arg18: memref<1x128xf32, #tpu.memory_space<vmem>>, %arg19: memref<1x128xf32, #tpu.memory_space<vmem>>, %arg20: memref<1x128xf32, #tpu.memory_space<vmem>>, %arg21: memref<128x256xbf16, #tpu.memory_space<vmem>>, %arg22: memref<1x256xf32, #tpu.memory_space<vmem>>, %arg23: memref<1x256xf32, #tpu.memory_space<vmem>>, %arg24: memref<1x256xf32, #tpu.memory_space<vmem>>, %arg25: memref<256x512xbf16, #tpu.memory_space<vmem>>, %arg26: memref<1x512xf32, #tpu.memory_space<vmem>>, %arg27: memref<1x512xf32, #tpu.memory_space<vmem>>, %arg28: memref<1x512xf32, #tpu.memory_space<vmem>>, %arg29: memref<512x128xbf16, #tpu.memory_space<vmem>>, %arg30: memref<1x128xf32, #tpu.memory_space<vmem>>, %arg31: memref<8x128xf32, #tpu.memory_space<vmem>>, %arg32: memref<8x128xf32, #tpu.memory_space<vmem>>) attributes {dimension_semantics = [], scalar_prefetch = 0 : i64, scratch_operands = 0 : i64, tpu.core_type = #tpu.core_type<tc>} {
    %c0 = arith.constant 0 : index
    %c0_0 = arith.constant 0 : index
    %0 = vector.load %arg0[%c0, %c0_0] : memref<8x128xf32, #tpu.memory_space<vmem>>, vector<8x128xf32>
    %c0_1 = arith.constant 0 : index
    %c0_2 = arith.constant 0 : index
    %1 = vector.load %arg1[%c0_1, %c0_2] : memref<128x512xbf16, #tpu.memory_space<vmem>>, vector<128x512xbf16>
    %c0_3 = arith.constant 0 : index
    %c0_4 = arith.constant 0 : index
    %2 = vector.load %arg2[%c0_3, %c0_4] : memref<1x512xf32, #tpu.memory_space<vmem>>, vector<1x512xf32>
    %3 = arith.truncf %0 : vector<8x128xf32> to vector<8x128xbf16>
    %cst = arith.constant dense<0.000000e+00> : vector<8x512xf32>
    %4 = tpu.matmul %3, %1, %cst {dimension_numbers = #tpu.dot_dimension_numbers<[1], [0], [0], [1], [0, 0, 1, 1], [], []>} : vector<8x128xbf16>, vector<128x512xbf16>, vector<8x512xf32> -> vector<8x512xf32>
    %5 = vector.broadcast %2 : vector<1x512xf32> to vector<8x512xf32>
    %6 = arith.addf %4, %5 : vector<8x512xf32>
    %c0_5 = arith.constant 0 : index
    %c0_6 = arith.constant 0 : index
    %7 = vector.load %arg3[%c0_5, %c0_6] : memref<1x512xf32, #tpu.memory_space<vmem>>, vector<1x512xf32>
    %c0_7 = arith.constant 0 : index
    %c0_8 = arith.constant 0 : index
    %8 = vector.load %arg4[%c0_7, %c0_8] : memref<1x512xf32, #tpu.memory_space<vmem>>, vector<1x512xf32>
    %cst_9 = arith.constant dense<0.000000e+00> : vector<512xf32>
    %9 = vector.multi_reduction <add>, %6, %cst_9 [0] : vector<8x512xf32> to vector<512xf32>
    %10 = vector.shape_cast %9 : vector<512xf32> to vector<1x512xf32>
    %cst_10 = arith.constant 8.000000e+00 : f32
    %11 = vector.broadcast %cst_10 : f32 to vector<1x512xf32>
    %12 = arith.divf %10, %11 : vector<1x512xf32>
    %13 = vector.broadcast %12 : vector<1x512xf32> to vector<8x512xf32>
    %14 = arith.subf %6, %13 : vector<8x512xf32>
    %15 = arith.mulf %14, %14 : vector<8x512xf32>
    %cst_11 = arith.constant dense<0.000000e+00> : vector<512xf32>
    %16 = vector.multi_reduction <add>, %15, %cst_11 [0] : vector<8x512xf32> to vector<512xf32>
    %17 = vector.shape_cast %16 : vector<512xf32> to vector<1x512xf32>
    %cst_12 = arith.constant 8.000000e+00 : f32
    %18 = vector.broadcast %cst_12 : f32 to vector<1x512xf32>
    %19 = arith.divf %17, %18 : vector<1x512xf32>
    %cst_13 = arith.constant 9.99999974E-6 : f32
    %20 = vector.broadcast %cst_13 : f32 to vector<1x512xf32>
    %21 = arith.addf %19, %20 : vector<1x512xf32>
    %22 = math.rsqrt %21 : vector<1x512xf32>
    %23 = arith.mulf %7, %22 : vector<1x512xf32>
    %24 = arith.mulf %12, %23 : vector<1x512xf32>
    %25 = arith.subf %8, %24 : vector<1x512xf32>
    %26 = vector.broadcast %23 : vector<1x512xf32> to vector<8x512xf32>
    %27 = arith.mulf %6, %26 : vector<8x512xf32>
    %28 = vector.broadcast %25 : vector<1x512xf32> to vector<8x512xf32>
    %29 = arith.addf %27, %28 : vector<8x512xf32>
    %cst_14 = arith.constant 0.000000e+00 : f32
    %30 = vector.broadcast %cst_14 : f32 to vector<8x512xf32>
    %31 = arith.cmpf oge, %29, %30 : vector<8x512xf32>
    %cst_15 = arith.constant 0.00999999977 : f32
    %32 = vector.broadcast %cst_15 : f32 to vector<8x512xf32>
    %33 = arith.mulf %32, %29 : vector<8x512xf32>
    %34 = arith.select %31, %29, %33 : vector<8x512xi1>, vector<8x512xf32>
    %c0_16 = arith.constant 0 : index
    %c0_17 = arith.constant 0 : index
    %35 = vector.load %arg5[%c0_16, %c0_17] : memref<512x256xbf16, #tpu.memory_space<vmem>>, vector<512x256xbf16>
    %c0_18 = arith.constant 0 : index
    %c0_19 = arith.constant 0 : index
    %36 = vector.load %arg6[%c0_18, %c0_19] : memref<1x256xf32, #tpu.memory_space<vmem>>, vector<1x256xf32>
    %37 = arith.truncf %34 : vector<8x512xf32> to vector<8x512xbf16>
    %cst_20 = arith.constant dense<0.000000e+00> : vector<8x256xf32>
    %38 = tpu.matmul %37, %35, %cst_20 {dimension_numbers = #tpu.dot_dimension_numbers<[1], [0], [0], [1], [0, 0, 1, 1], [], []>} : vector<8x512xbf16>, vector<512x256xbf16>, vector<8x256xf32> -> vector<8x256xf32>
    %39 = vector.broadcast %36 : vector<1x256xf32> to vector<8x256xf32>
    %40 = arith.addf %38, %39 : vector<8x256xf32>
    %c0_21 = arith.constant 0 : index
    %c0_22 = arith.constant 0 : index
    %41 = vector.load %arg7[%c0_21, %c0_22] : memref<1x256xf32, #tpu.memory_space<vmem>>, vector<1x256xf32>
    %c0_23 = arith.constant 0 : index
    %c0_24 = arith.constant 0 : index
    %42 = vector.load %arg8[%c0_23, %c0_24] : memref<1x256xf32, #tpu.memory_space<vmem>>, vector<1x256xf32>
    %cst_25 = arith.constant dense<0.000000e+00> : vector<256xf32>
    %43 = vector.multi_reduction <add>, %40, %cst_25 [0] : vector<8x256xf32> to vector<256xf32>
    %44 = vector.shape_cast %43 : vector<256xf32> to vector<1x256xf32>
    %cst_26 = arith.constant 8.000000e+00 : f32
    %45 = vector.broadcast %cst_26 : f32 to vector<1x256xf32>
    %46 = arith.divf %44, %45 : vector<1x256xf32>
    %47 = vector.broadcast %46 : vector<1x256xf32> to vector<8x256xf32>
    %48 = arith.subf %40, %47 : vector<8x256xf32>
    %49 = arith.mulf %48, %48 : vector<8x256xf32>
    %cst_27 = arith.constant dense<0.000000e+00> : vector<256xf32>
    %50 = vector.multi_reduction <add>, %49, %cst_27 [0] : vector<8x256xf32> to vector<256xf32>
    %51 = vector.shape_cast %50 : vector<256xf32> to vector<1x256xf32>
    %cst_28 = arith.constant 8.000000e+00 : f32
    %52 = vector.broadcast %cst_28 : f32 to vector<1x256xf32>
    %53 = arith.divf %51, %52 : vector<1x256xf32>
    %cst_29 = arith.constant 9.99999974E-6 : f32
    %54 = vector.broadcast %cst_29 : f32 to vector<1x256xf32>
    %55 = arith.addf %53, %54 : vector<1x256xf32>
    %56 = math.rsqrt %55 : vector<1x256xf32>
    %57 = arith.mulf %41, %56 : vector<1x256xf32>
    %58 = arith.mulf %46, %57 : vector<1x256xf32>
    %59 = arith.subf %42, %58 : vector<1x256xf32>
    %60 = vector.broadcast %57 : vector<1x256xf32> to vector<8x256xf32>
    %61 = arith.mulf %40, %60 : vector<8x256xf32>
    %62 = vector.broadcast %59 : vector<1x256xf32> to vector<8x256xf32>
    %63 = arith.addf %61, %62 : vector<8x256xf32>
    %cst_30 = arith.constant 0.000000e+00 : f32
    %64 = vector.broadcast %cst_30 : f32 to vector<8x256xf32>
    %65 = arith.cmpf oge, %63, %64 : vector<8x256xf32>
    %cst_31 = arith.constant 0.00999999977 : f32
    %66 = vector.broadcast %cst_31 : f32 to vector<8x256xf32>
    %67 = arith.mulf %66, %63 : vector<8x256xf32>
    %68 = arith.select %65, %63, %67 : vector<8x256xi1>, vector<8x256xf32>
    %c0_32 = arith.constant 0 : index
    %c0_33 = arith.constant 0 : index
    %69 = vector.load %arg9[%c0_32, %c0_33] : memref<256x128xbf16, #tpu.memory_space<vmem>>, vector<256x128xbf16>
    %c0_34 = arith.constant 0 : index
    %c0_35 = arith.constant 0 : index
    %70 = vector.load %arg10[%c0_34, %c0_35] : memref<1x128xf32, #tpu.memory_space<vmem>>, vector<1x128xf32>
    %71 = arith.truncf %68 : vector<8x256xf32> to vector<8x256xbf16>
    %cst_36 = arith.constant dense<0.000000e+00> : vector<8x128xf32>
    %72 = tpu.matmul %71, %69, %cst_36 {dimension_numbers = #tpu.dot_dimension_numbers<[1], [0], [0], [1], [0, 0, 1, 1], [], []>} : vector<8x256xbf16>, vector<256x128xbf16>, vector<8x128xf32> -> vector<8x128xf32>
    %73 = vector.broadcast %70 : vector<1x128xf32> to vector<8x128xf32>
    %74 = arith.addf %72, %73 : vector<8x128xf32>
    %c0_37 = arith.constant 0 : index
    %c0_38 = arith.constant 0 : index
    %75 = vector.load %arg11[%c0_37, %c0_38] : memref<1x128xf32, #tpu.memory_space<vmem>>, vector<1x128xf32>
    %c0_39 = arith.constant 0 : index
    %c0_40 = arith.constant 0 : index
    %76 = vector.load %arg12[%c0_39, %c0_40] : memref<1x128xf32, #tpu.memory_space<vmem>>, vector<1x128xf32>
    %cst_41 = arith.constant dense<0.000000e+00> : vector<128xf32>
    %77 = vector.multi_reduction <add>, %74, %cst_41 [0] : vector<8x128xf32> to vector<128xf32>
    %78 = vector.shape_cast %77 : vector<128xf32> to vector<1x128xf32>
    %cst_42 = arith.constant 8.000000e+00 : f32
    %79 = vector.broadcast %cst_42 : f32 to vector<1x128xf32>
    %80 = arith.divf %78, %79 : vector<1x128xf32>
    %81 = vector.broadcast %80 : vector<1x128xf32> to vector<8x128xf32>
    %82 = arith.subf %74, %81 : vector<8x128xf32>
    %83 = arith.mulf %82, %82 : vector<8x128xf32>
    %cst_43 = arith.constant dense<0.000000e+00> : vector<128xf32>
    %84 = vector.multi_reduction <add>, %83, %cst_43 [0] : vector<8x128xf32> to vector<128xf32>
    %85 = vector.shape_cast %84 : vector<128xf32> to vector<1x128xf32>
    %cst_44 = arith.constant 8.000000e+00 : f32
    %86 = vector.broadcast %cst_44 : f32 to vector<1x128xf32>
    %87 = arith.divf %85, %86 : vector<1x128xf32>
    %cst_45 = arith.constant 9.99999974E-6 : f32
    %88 = vector.broadcast %cst_45 : f32 to vector<1x128xf32>
    %89 = arith.addf %87, %88 : vector<1x128xf32>
    %90 = math.rsqrt %89 : vector<1x128xf32>
    %91 = arith.mulf %75, %90 : vector<1x128xf32>
    %92 = arith.mulf %80, %91 : vector<1x128xf32>
    %93 = arith.subf %76, %92 : vector<1x128xf32>
    %94 = vector.broadcast %91 : vector<1x128xf32> to vector<8x128xf32>
    %95 = arith.mulf %74, %94 : vector<8x128xf32>
    %96 = vector.broadcast %93 : vector<1x128xf32> to vector<8x128xf32>
    %97 = arith.addf %95, %96 : vector<8x128xf32>
    %cst_46 = arith.constant 0.000000e+00 : f32
    %98 = vector.broadcast %cst_46 : f32 to vector<8x128xf32>
    %99 = arith.cmpf oge, %97, %98 : vector<8x128xf32>
    %cst_47 = arith.constant 0.00999999977 : f32
    %100 = vector.broadcast %cst_47 : f32 to vector<8x128xf32>
    %101 = arith.mulf %100, %97 : vector<8x128xf32>
    %102 = arith.select %99, %97, %101 : vector<8x128xi1>, vector<8x128xf32>
    %c0_48 = arith.constant 0 : index
    %c0_49 = arith.constant 0 : index
    %103 = vector.load %arg13[%c0_48, %c0_49] : memref<128x128xbf16, #tpu.memory_space<vmem>>, vector<128x128xbf16>
    %c0_50 = arith.constant 0 : index
    %c0_51 = arith.constant 0 : index
    %104 = vector.load %arg14[%c0_50, %c0_51] : memref<1x128xf32, #tpu.memory_space<vmem>>, vector<1x128xf32>
    %105 = arith.truncf %102 : vector<8x128xf32> to vector<8x128xbf16>
    %cst_52 = arith.constant dense<0.000000e+00> : vector<8x128xf32>
    %106 = tpu.matmul %105, %103, %cst_52 {dimension_numbers = #tpu.dot_dimension_numbers<[1], [0], [0], [1], [0, 0, 1, 1], [], []>} : vector<8x128xbf16>, vector<128x128xbf16>, vector<8x128xf32> -> vector<8x128xf32>
    %107 = vector.broadcast %104 : vector<1x128xf32> to vector<8x128xf32>
    %108 = arith.addf %106, %107 : vector<8x128xf32>
    %c0_53 = arith.constant 0 : index
    %c0_54 = arith.constant 0 : index
    %109 = vector.load %arg15[%c0_53, %c0_54] : memref<1x128xf32, #tpu.memory_space<vmem>>, vector<1x128xf32>
    %c0_55 = arith.constant 0 : index
    %c0_56 = arith.constant 0 : index
    %110 = vector.load %arg16[%c0_55, %c0_56] : memref<1x128xf32, #tpu.memory_space<vmem>>, vector<1x128xf32>
    %cst_57 = arith.constant dense<0.000000e+00> : vector<128xf32>
    %111 = vector.multi_reduction <add>, %108, %cst_57 [0] : vector<8x128xf32> to vector<128xf32>
    %112 = vector.shape_cast %111 : vector<128xf32> to vector<1x128xf32>
    %cst_58 = arith.constant 8.000000e+00 : f32
    %113 = vector.broadcast %cst_58 : f32 to vector<1x128xf32>
    %114 = arith.divf %112, %113 : vector<1x128xf32>
    %115 = vector.broadcast %114 : vector<1x128xf32> to vector<8x128xf32>
    %116 = arith.subf %108, %115 : vector<8x128xf32>
    %117 = arith.mulf %116, %116 : vector<8x128xf32>
    %cst_59 = arith.constant dense<0.000000e+00> : vector<128xf32>
    %118 = vector.multi_reduction <add>, %117, %cst_59 [0] : vector<8x128xf32> to vector<128xf32>
    %119 = vector.shape_cast %118 : vector<128xf32> to vector<1x128xf32>
    %cst_60 = arith.constant 8.000000e+00 : f32
    %120 = vector.broadcast %cst_60 : f32 to vector<1x128xf32>
    %121 = arith.divf %119, %120 : vector<1x128xf32>
    %cst_61 = arith.constant 9.99999974E-6 : f32
    %122 = vector.broadcast %cst_61 : f32 to vector<1x128xf32>
    %123 = arith.addf %121, %122 : vector<1x128xf32>
    %124 = math.rsqrt %123 : vector<1x128xf32>
    %125 = arith.mulf %109, %124 : vector<1x128xf32>
    %126 = arith.mulf %114, %125 : vector<1x128xf32>
    %127 = arith.subf %110, %126 : vector<1x128xf32>
    %128 = vector.broadcast %125 : vector<1x128xf32> to vector<8x128xf32>
    %129 = arith.mulf %108, %128 : vector<8x128xf32>
    %130 = vector.broadcast %127 : vector<1x128xf32> to vector<8x128xf32>
    %131 = arith.addf %129, %130 : vector<8x128xf32>
    %cst_62 = arith.constant 0.000000e+00 : f32
    %132 = vector.broadcast %cst_62 : f32 to vector<8x128xf32>
    %133 = arith.cmpf oge, %131, %132 : vector<8x128xf32>
    %cst_63 = arith.constant 0.00999999977 : f32
    %134 = vector.broadcast %cst_63 : f32 to vector<8x128xf32>
    %135 = arith.mulf %134, %131 : vector<8x128xf32>
    %136 = arith.select %133, %131, %135 : vector<8x128xi1>, vector<8x128xf32>
    %c0_64 = arith.constant 0 : index
    %c0_65 = arith.constant 0 : index
    %137 = vector.load %arg31[%c0_64, %c0_65] : memref<8x128xf32, #tpu.memory_space<vmem>>, vector<8x128xf32>
    tpu.vector_store %arg31[%c0_64, %c0_65], %136 {strides = array<i32>} : memref<8x128xf32, #tpu.memory_space<vmem>>, vector<8x128xf32>,
    %c0_66 = arith.constant 0 : index
    %c0_67 = arith.constant 0 : index
    %138 = vector.load %arg17[%c0_66, %c0_67] : memref<128x128xbf16, #tpu.memory_space<vmem>>, vector<128x128xbf16>
    %c0_68 = arith.constant 0 : index
    %c0_69 = arith.constant 0 : index
    %139 = vector.load %arg18[%c0_68, %c0_69] : memref<1x128xf32, #tpu.memory_space<vmem>>, vector<1x128xf32>
    %140 = arith.truncf %136 : vector<8x128xf32> to vector<8x128xbf16>
    %cst_70 = arith.constant dense<0.000000e+00> : vector<8x128xf32>
    %141 = tpu.matmul %140, %138, %cst_70 {dimension_numbers = #tpu.dot_dimension_numbers<[1], [0], [0], [1], [0, 0, 1, 1], [], []>} : vector<8x128xbf16>, vector<128x128xbf16>, vector<8x128xf32> -> vector<8x128xf32>
    %142 = vector.broadcast %139 : vector<1x128xf32> to vector<8x128xf32>
    %143 = arith.addf %141, %142 : vector<8x128xf32>
    %c0_71 = arith.constant 0 : index
    %c0_72 = arith.constant 0 : index
    %144 = vector.load %arg19[%c0_71, %c0_72] : memref<1x128xf32, #tpu.memory_space<vmem>>, vector<1x128xf32>
    %c0_73 = arith.constant 0 : index
    %c0_74 = arith.constant 0 : index
    %145 = vector.load %arg20[%c0_73, %c0_74] : memref<1x128xf32, #tpu.memory_space<vmem>>, vector<1x128xf32>
    %cst_75 = arith.constant dense<0.000000e+00> : vector<128xf32>
    %146 = vector.multi_reduction <add>, %143, %cst_75 [0] : vector<8x128xf32> to vector<128xf32>
    %147 = vector.shape_cast %146 : vector<128xf32> to vector<1x128xf32>
    %cst_76 = arith.constant 8.000000e+00 : f32
    %148 = vector.broadcast %cst_76 : f32 to vector<1x128xf32>
    %149 = arith.divf %147, %148 : vector<1x128xf32>
    %150 = vector.broadcast %149 : vector<1x128xf32> to vector<8x128xf32>
    %151 = arith.subf %143, %150 : vector<8x128xf32>
    %152 = arith.mulf %151, %151 : vector<8x128xf32>
    %cst_77 = arith.constant dense<0.000000e+00> : vector<128xf32>
    %153 = vector.multi_reduction <add>, %152, %cst_77 [0] : vector<8x128xf32> to vector<128xf32>
    %154 = vector.shape_cast %153 : vector<128xf32> to vector<1x128xf32>
    %cst_78 = arith.constant 8.000000e+00 : f32
    %155 = vector.broadcast %cst_78 : f32 to vector<1x128xf32>
    %156 = arith.divf %154, %155 : vector<1x128xf32>
    %cst_79 = arith.constant 9.99999974E-6 : f32
    %157 = vector.broadcast %cst_79 : f32 to vector<1x128xf32>
    %158 = arith.addf %156, %157 : vector<1x128xf32>
    %159 = math.rsqrt %158 : vector<1x128xf32>
    %160 = arith.mulf %144, %159 : vector<1x128xf32>
    %161 = arith.mulf %149, %160 : vector<1x128xf32>
    %162 = arith.subf %145, %161 : vector<1x128xf32>
    %163 = vector.broadcast %160 : vector<1x128xf32> to vector<8x128xf32>
    %164 = arith.mulf %143, %163 : vector<8x128xf32>
    %165 = vector.broadcast %162 : vector<1x128xf32> to vector<8x128xf32>
    %166 = arith.addf %164, %165 : vector<8x128xf32>
    %cst_80 = arith.constant 0.000000e+00 : f32
    %167 = vector.broadcast %cst_80 : f32 to vector<8x128xf32>
    %168 = arith.cmpf oge, %166, %167 : vector<8x128xf32>
    %cst_81 = arith.constant 0.00999999977 : f32
    %169 = vector.broadcast %cst_81 : f32 to vector<8x128xf32>
    %170 = arith.mulf %169, %166 : vector<8x128xf32>
    %171 = arith.select %168, %166, %170 : vector<8x128xi1>, vector<8x128xf32>
    %c0_82 = arith.constant 0 : index
    %c0_83 = arith.constant 0 : index
    %172 = vector.load %arg21[%c0_82, %c0_83] : memref<128x256xbf16, #tpu.memory_space<vmem>>, vector<128x256xbf16>
    %c0_84 = arith.constant 0 : index
    %c0_85 = arith.constant 0 : index
    %173 = vector.load %arg22[%c0_84, %c0_85] : memref<1x256xf32, #tpu.memory_space<vmem>>, vector<1x256xf32>
    %174 = arith.truncf %171 : vector<8x128xf32> to vector<8x128xbf16>
    %cst_86 = arith.constant dense<0.000000e+00> : vector<8x256xf32>
    %175 = tpu.matmul %174, %172, %cst_86 {dimension_numbers = #tpu.dot_dimension_numbers<[1], [0], [0], [1], [0, 0, 1, 1], [], []>} : vector<8x128xbf16>, vector<128x256xbf16>, vector<8x256xf32> -> vector<8x256xf32>
    %176 = vector.broadcast %173 : vector<1x256xf32> to vector<8x256xf32>
    %177 = arith.addf %175, %176 : vector<8x256xf32>
    %c0_87 = arith.constant 0 : index
    %c0_88 = arith.constant 0 : index
    %178 = vector.load %arg23[%c0_87, %c0_88] : memref<1x256xf32, #tpu.memory_space<vmem>>, vector<1x256xf32>
    %c0_89 = arith.constant 0 : index
    %c0_90 = arith.constant 0 : index
    %179 = vector.load %arg24[%c0_89, %c0_90] : memref<1x256xf32, #tpu.memory_space<vmem>>, vector<1x256xf32>
    %cst_91 = arith.constant dense<0.000000e+00> : vector<256xf32>
    %180 = vector.multi_reduction <add>, %177, %cst_91 [0] : vector<8x256xf32> to vector<256xf32>
    %181 = vector.shape_cast %180 : vector<256xf32> to vector<1x256xf32>
    %cst_92 = arith.constant 8.000000e+00 : f32
    %182 = vector.broadcast %cst_92 : f32 to vector<1x256xf32>
    %183 = arith.divf %181, %182 : vector<1x256xf32>
    %184 = vector.broadcast %183 : vector<1x256xf32> to vector<8x256xf32>
    %185 = arith.subf %177, %184 : vector<8x256xf32>
    %186 = arith.mulf %185, %185 : vector<8x256xf32>
    %cst_93 = arith.constant dense<0.000000e+00> : vector<256xf32>
    %187 = vector.multi_reduction <add>, %186, %cst_93 [0] : vector<8x256xf32> to vector<256xf32>
    %188 = vector.shape_cast %187 : vector<256xf32> to vector<1x256xf32>
    %cst_94 = arith.constant 8.000000e+00 : f32
    %189 = vector.broadcast %cst_94 : f32 to vector<1x256xf32>
    %190 = arith.divf %188, %189 : vector<1x256xf32>
    %cst_95 = arith.constant 9.99999974E-6 : f32
    %191 = vector.broadcast %cst_95 : f32 to vector<1x256xf32>
    %192 = arith.addf %190, %191 : vector<1x256xf32>
    %193 = math.rsqrt %192 : vector<1x256xf32>
    %194 = arith.mulf %178, %193 : vector<1x256xf32>
    %195 = arith.mulf %183, %194 : vector<1x256xf32>
    %196 = arith.subf %179, %195 : vector<1x256xf32>
    %197 = vector.broadcast %194 : vector<1x256xf32> to vector<8x256xf32>
    %198 = arith.mulf %177, %197 : vector<8x256xf32>
    %199 = vector.broadcast %196 : vector<1x256xf32> to vector<8x256xf32>
    %200 = arith.addf %198, %199 : vector<8x256xf32>
    %cst_96 = arith.constant 0.000000e+00 : f32
    %201 = vector.broadcast %cst_96 : f32 to vector<8x256xf32>
    %202 = arith.cmpf oge, %200, %201 : vector<8x256xf32>
    %cst_97 = arith.constant 0.00999999977 : f32
    %203 = vector.broadcast %cst_97 : f32 to vector<8x256xf32>
    %204 = arith.mulf %203, %200 : vector<8x256xf32>
    %205 = arith.select %202, %200, %204 : vector<8x256xi1>, vector<8x256xf32>
    %c0_98 = arith.constant 0 : index
    %c0_99 = arith.constant 0 : index
    %206 = vector.load %arg25[%c0_98, %c0_99] : memref<256x512xbf16, #tpu.memory_space<vmem>>, vector<256x512xbf16>
    %c0_100 = arith.constant 0 : index
    %c0_101 = arith.constant 0 : index
    %207 = vector.load %arg26[%c0_100, %c0_101] : memref<1x512xf32, #tpu.memory_space<vmem>>, vector<1x512xf32>
    %208 = arith.truncf %205 : vector<8x256xf32> to vector<8x256xbf16>
    %cst_102 = arith.constant dense<0.000000e+00> : vector<8x512xf32>
    %209 = tpu.matmul %208, %206, %cst_102 {dimension_numbers = #tpu.dot_dimension_numbers<[1], [0], [0], [1], [0, 0, 1, 1], [], []>} : vector<8x256xbf16>, vector<256x512xbf16>, vector<8x512xf32> -> vector<8x512xf32>
    %210 = vector.broadcast %207 : vector<1x512xf32> to vector<8x512xf32>
    %211 = arith.addf %209, %210 : vector<8x512xf32>
    %c0_103 = arith.constant 0 : index
    %c0_104 = arith.constant 0 : index
    %212 = vector.load %arg27[%c0_103, %c0_104] : memref<1x512xf32, #tpu.memory_space<vmem>>, vector<1x512xf32>
    %c0_105 = arith.constant 0 : index
    %c0_106 = arith.constant 0 : index
    %213 = vector.load %arg28[%c0_105, %c0_106] : memref<1x512xf32, #tpu.memory_space<vmem>>, vector<1x512xf32>
    %cst_107 = arith.constant dense<0.000000e+00> : vector<512xf32>
    %214 = vector.multi_reduction <add>, %211, %cst_107 [0] : vector<8x512xf32> to vector<512xf32>
    %215 = vector.shape_cast %214 : vector<512xf32> to vector<1x512xf32>
    %cst_108 = arith.constant 8.000000e+00 : f32
    %216 = vector.broadcast %cst_108 : f32 to vector<1x512xf32>
    %217 = arith.divf %215, %216 : vector<1x512xf32>
    %218 = vector.broadcast %217 : vector<1x512xf32> to vector<8x512xf32>
    %219 = arith.subf %211, %218 : vector<8x512xf32>
    %220 = arith.mulf %219, %219 : vector<8x512xf32>
    %cst_109 = arith.constant dense<0.000000e+00> : vector<512xf32>
    %221 = vector.multi_reduction <add>, %220, %cst_109 [0] : vector<8x512xf32> to vector<512xf32>
    %222 = vector.shape_cast %221 : vector<512xf32> to vector<1x512xf32>
    %cst_110 = arith.constant 8.000000e+00 : f32
    %223 = vector.broadcast %cst_110 : f32 to vector<1x512xf32>
    %224 = arith.divf %222, %223 : vector<1x512xf32>
    %cst_111 = arith.constant 9.99999974E-6 : f32
    %225 = vector.broadcast %cst_111 : f32 to vector<1x512xf32>
    %226 = arith.addf %224, %225 : vector<1x512xf32>
    %227 = math.rsqrt %226 : vector<1x512xf32>
    %228 = arith.mulf %212, %227 : vector<1x512xf32>
    %229 = arith.mulf %217, %228 : vector<1x512xf32>
    %230 = arith.subf %213, %229 : vector<1x512xf32>
    %231 = vector.broadcast %228 : vector<1x512xf32> to vector<8x512xf32>
    %232 = arith.mulf %211, %231 : vector<8x512xf32>
    %233 = vector.broadcast %230 : vector<1x512xf32> to vector<8x512xf32>
    %234 = arith.addf %232, %233 : vector<8x512xf32>
    %cst_112 = arith.constant 0.000000e+00 : f32
    %235 = vector.broadcast %cst_112 : f32 to vector<8x512xf32>
    %236 = arith.cmpf oge, %234, %235 : vector<8x512xf32>
    %cst_113 = arith.constant 0.00999999977 : f32
    %237 = vector.broadcast %cst_113 : f32 to vector<8x512xf32>
    %238 = arith.mulf %237, %234 : vector<8x512xf32>
    %239 = arith.select %236, %234, %238 : vector<8x512xi1>, vector<8x512xf32>
    %c0_114 = arith.constant 0 : index
    %c0_115 = arith.constant 0 : index
    %240 = vector.load %arg29[%c0_114, %c0_115] : memref<512x128xbf16, #tpu.memory_space<vmem>>, vector<512x128xbf16>
    %c0_116 = arith.constant 0 : index
    %c0_117 = arith.constant 0 : index
    %241 = vector.load %arg30[%c0_116, %c0_117] : memref<1x128xf32, #tpu.memory_space<vmem>>, vector<1x128xf32>
    %242 = arith.truncf %239 : vector<8x512xf32> to vector<8x512xbf16>
    %cst_118 = arith.constant dense<0.000000e+00> : vector<8x128xf32>
    %243 = tpu.matmul %242, %240, %cst_118 {dimension_numbers = #tpu.dot_dimension_numbers<[1], [0], [0], [1], [0, 0, 1, 1], [], []>} : vector<8x512xbf16>, vector<512x128xbf16>, vector<8x128xf32> -> vector<8x128xf32>
    %244 = vector.broadcast %241 : vector<1x128xf32> to vector<8x128xf32>
    %245 = arith.addf %243, %244 : vector<8x128xf32>
    %cst_119 = arith.constant 0.000000e+00 : f32
    %246 = vector.broadcast %cst_119 : f32 to vector<8x128xf32>
    %247 = arith.cmpf oge, %245, %246 : vector<8x128xf32>
    %cst_120 = arith.constant 0.00999999977 : f32
    %248 = vector.broadcast %cst_120 : f32 to vector<8x128xf32>
    %249 = arith.mulf %248, %245 : vector<8x128xf32>
    %250 = arith.select %247, %245, %249 : vector<8x128xi1>, vector<8x128xf32>
    %c0_121 = arith.constant 0 : index
    %c0_122 = arith.constant 0 : index
    %251 = vector.load %arg32[%c0_121, %c0_122] : memref<8x128xf32, #tpu.memory_space<vmem>>, vector<8x128xf32>
    tpu.vector_store %arg32[%c0_121, %c0_122], %250 {strides = array<i32>} : memref<8x128xf32, #tpu.memory_space<vmem>>, vector<8x128xf32>,
    return
  }
}

</mosaic_0001>

<bundles_post_ra>
// kernel: tpu_custom_call.1
= control target key start
LH: loop header
LB: loop body
LE: loop exit
PB: predicated region body
PF: predicated region fallthrough
CT: control target
= control target key end

     0   :  { %s4488_s6 = smov 1   ;;  %s4489_s10 = smov 2   ;;  %s4951_s0 = inlined_call_operand.smem [shape: u32[33], index: -1, kind: input, shape index: {}] }
   0x1   :  { %s4556_s5 = sld [smem:[%s4951_s0]]   ;;  %s4490_s14 = smov 3  }
   0x2   :  { %s4561_s9 = sld [smem:[%s4951_s0 + %s4488_s6]]   ;;  %s4491_s18 = smov 4  }
   0x3   :  { %s4566_s13 = sld [smem:[%s4951_s0 + %s4489_s10]]   ;;  %s4492_s22 = smov 5  }
   0x4   :  { %s4571_s17 = sld [smem:[%s4951_s0 + %s4490_s14]]   ;;  %s4493_s26 = smov 6  }
   0x5   :  { %s4576_s21 = sld [smem:[%s4951_s0 + %s4491_s18]]   ;;  %s4494_s30 = smov 7  }
   0x6   :  { %s4581_s25 = sld [smem:[%s4951_s0 + %s4492_s22]]   ;;  %s4495_s4 = smov 8  }
   0x7   :  { %s4586_s29 = sld [smem:[%s4951_s0 + %s4493_s26]]   ;;  %s4496_s10 = smov 9  }
   0x8   :  { %s4591_s3 = sld [smem:[%s4951_s0 + %s4494_s30]]   ;;  %s4497_s15 = smov 10  }
   0x9   :  { %s4596_s8 = sld [smem:[%s4951_s0 + %s4495_s4]]   ;;  %s4498_s20 = smov 11  }
   0xa   :  { %4952 = sst [smem:[#allocation42_spill]] %s4571_s17  ;;  %s4499_s26 = smov 12  }
   0xb   :  { %s4601_s14 = sld [smem:[%s4951_s0 + %s4496_s10]]   ;;  %s4500_s1 = smov 13  }
   0xc   :  { %s4606_s19 = sld [smem:[%s4951_s0 + %s4497_s15]]   ;;  %s4501_s7 = smov 14  }
   0xd   :  { %s4611_s24 = sld [smem:[%s4951_s0 + %s4498_s20]]   ;;  %s4502_s15 = smov 15  }
   0xe   :  { %s4616_s30 = sld [smem:[%s4951_s0 + %s4499_s26]]   ;;  %s4503_s22 = smov 16  }
   0xf   :  { %s4621_s6 = sld [smem:[%s4951_s0 + %s4500_s1]]   ;;  %s4504_s28 = smov 17  }
  0x10   :  { %s4626_s12 = sld [smem:[%s4951_s0 + %s4501_s7]]   ;;  %s4505_s7 = smov 18  }
  0x11   :  { %s4631_s20 = sld [smem:[%s4951_s0 + %s4502_s15]]   ;;  %s4506_s15 = smov 19  }
  0x12   :  { %s4636_s27 = sld [smem:[%s4951_s0 + %s4503_s22]]   ;;  %s4507_s22 = smov 20  }
  0x13   :  { %s4641_s4 = sld [smem:[%s4951_s0 + %s4504_s28]]   ;;  %s4508_s28 = smov 21  }
  0x14   :  { %4953 = sst [smem:[#allocation43_spill]] %s4616_s30 }
  0x15   :  { %s4661_s30 = sld [smem:[%s4951_s0 + %s4508_s28]]   ;;  %s4512_s28 = smov 25  }
  0x16   :  { %4954 = sst [smem:[#allocation44_spill]] %s4626_s12 }
  0x17   :  { %4955 = sst [smem:[#allocation45_spill]] %s4631_s20 }
  0x18   :  { %4956 = sst [smem:[#allocation46_spill]] %s4636_s27 }
  0x19   :  { %s4646_s12 = sld [smem:[%s4951_s0 + %s4505_s7]]   ;;  %s4509_s7 = smov 22  }
  0x1a   :  { %s4651_s20 = sld [smem:[%s4951_s0 + %s4506_s15]]   ;;  %s4510_s15 = smov 23  }
  0x1b   :  { %s4656_s27 = sld [smem:[%s4951_s0 + %s4507_s22]]   ;;  %s4511_s22 = smov 24  }
  0x1c   :  { %s4681_s17 = sld [smem:[%s4951_s0 + %s4512_s28]]   ;;  %s4516_s28 = smov 29  }
  0x1f   :  { %4957 = sst [smem:[#allocation47_spill]] %s4646_s12 }
  0x20   :  { %4958 = sst [smem:[#allocation48_spill]] %s4651_s20 }
  0x21   :  { %4959 = sst [smem:[#allocation49_spill]] %s4656_s27 }
  0x22   :  { %s4666_s12 = sld [smem:[%s4951_s0 + %s4509_s7]]   ;;  %s4513_s7 = smov 26  }
  0x23   :  { %s4671_s20 = sld [smem:[%s4951_s0 + %s4510_s15]]   ;;  %s4514_s15 = smov 27  }
  0x24   :  { %s4676_s27 = sld [smem:[%s4951_s0 + %s4511_s22]]   ;;  %s4515_s22 = smov 28  }
  0x25   :  { %4963 = sst [smem:[#allocation53_spill]] %s4681_s17 }
  0x26   :  { %s4701_s17 = sld [smem:[%s4951_s0 + %s4516_s28]]  }
  0x28   :  { %4960 = sst [smem:[#allocation50_spill]] %s4666_s12 }
  0x29   :  { %4961 = sst [smem:[#allocation51_spill]] %s4671_s20 }
  0x2a   :  { %4962 = sst [smem:[#allocation52_spill]] %s4676_s27 }
  0x2b   :  { %s4686_s12 = sld [smem:[%s4951_s0 + %s4513_s7]]   ;;  %s4517_s7 = smov 30  }
  0x2c   :  { %s4691_s20 = sld [smem:[%s4951_s0 + %s4514_s15]]   ;;  %s4518_s15 = smov 31  }
  0x2d   :  { %s4696_s27 = sld [smem:[%s4951_s0 + %s4515_s22]]   ;;  %s4519_s22 = smov 32  }
  0x31   :  { %4964 = sst [smem:[#allocation54_spill]] %s4686_s12 }
  0x32   :  { %4965 = sst [smem:[#allocation55_spill]] %s4691_s20 }
  0x33   :  { %4966 = sst [smem:[#allocation56_spill]] %s4696_s27 }
  0x34   :  { %s4706_s12 = sld [smem:[%s4951_s0 + %s4517_s7]]  }
  0x35   :  { %s4711_s20 = sld [smem:[%s4951_s0 + %s4518_s15]]  }
  0x36   :  { %s4716_s27 = sld [smem:[%s4951_s0 + %s4519_s22]]  }
  0x37   :  { %71 = vsyncpa [#allocation3], 0 }
  0x38   :  { %72 = vsyncpa [#allocation6], 0 }
  0x39   :  { %73 = vsyncpa [#allocation9], 0 }
  0x3a   :  { %74 = vsyncpa [#allocation12], 0 }
  0x3b   :  { %75 = vsyncpa [#allocation15], 0 }
  0x3c   :  { %76 = vsyncpa [#allocation18], 0 }
  0x3d   :  { %77 = vsyncpa [#allocation21], 0 }
  0x3e   :  { %78 = vsyncpa [#allocation24], 0 }
  0x3f   :  { %79 = vsyncpa [#allocation27], 0 }
  0x40   :  { %80 = vsyncpa [#allocation4], 0 }
  0x41   :  { %81 = vsyncpa [#allocation30], 0  ;;  %s4520_s28 = smov [#allocation5]  }
  0x42   :  { %s97_s1 = sshll.u32 %s4520_s28, 4  ;;  %s98_s1 = int_to_ptr.vmem [resolvable:$true] %s97_s1 }
  0x43   :  { %s4114_s2 = scalar_lea.vmem %s98_s1, 4096  ;;  %p4119_p1 = scmp.lt.s32.totalorder %s98_s1, %s98_s1 }
  0x44   :  { %p4115_p0 = scmp.ne.s32.totalorder %s98_s1, %s4114_s2  ;;  %p4120_p2 = scmp.lt.s32.totalorder %s4114_s2, %s4114_s2 }
  0x46   :  { %p4121_p3 = por %p4120_p2, %p4119_p1 }
  0x48   :  { %p4122_p4 = pnand %p4121_p3, %p4115_p0 }
  0x4a   :  { %4125 = shalt.err (!%p4122_p4)
}
  0x4b   :  { %s4521_s0 = smov 256   ;;  %s4522_s7 = smov 16  }
  0x4c   :  { %103 = dma.hbm_to_vmem [thread:$0]  %s4561_s9, 4096, %s98_s1, [#allocation6], %s4521_s0, %s4521_s0, %s4522_s7  }
  0x4d   :  { %s4523_s10 = smov [#allocation8]   ;;  %s4524_s15 = smov [#allocation11]  }
  0x4e   :  { %s122_s11 = sshll.u32 %s4523_s10, 4  ;;  %s144_s16 = sshll.u32 %s4524_s15, 4  ;;  %s123_s11 = int_to_ptr.vmem [resolvable:$true] %s122_s11  ;;  %s145_s16 = int_to_ptr.vmem [resolvable:$true] %s144_s16 }
  0x4f   :  { %s4134_s18 = scalar_lea.vmem %s123_s11, 64  ;;  %p4139_p6 = scmp.lt.s32.totalorder %s123_s11, %s123_s11 }
  0x50   :  { %p4135_p5 = scmp.ne.s32.totalorder %s123_s11, %s4134_s18  ;;  %p4140_p7 = scmp.lt.s32.totalorder %s4134_s18, %s4134_s18 }
  0x52   :  { %p4141_p8 = por %p4140_p7, %p4139_p6 }
  0x54   :  { %p4142_p9 = pnand %p4141_p8, %p4135_p5 }
  0x56   :  { %4145 = shalt.err (!%p4142_p9)
}
  0x57   :  { %125 = dma.hbm_to_vmem [thread:$0]  %s4576_s21, 64, %s123_s11, [#allocation9]  }
  0x58   :  { %s4154_s22 = scalar_lea.vmem %s145_s16, 32  ;;  %p4159_p11 = scmp.lt.s32.totalorder %s145_s16, %s145_s16 }
  0x59   :  { %p4155_p10 = scmp.ne.s32.totalorder %s145_s16, %s4154_s22  ;;  %p4160_p12 = scmp.lt.s32.totalorder %s4154_s22, %s4154_s22 }
  0x5b   :  { %p4161_p13 = por %p4160_p12, %p4159_p11 }
  0x5d   :  { %p4162_p0 = pnand %p4161_p13, %p4155_p10 }
  0x5f   :  { %4165 = shalt.err (!%p4162_p0)
}
  0x60   :  { %147 = dma.hbm_to_vmem [thread:$0]  %s4586_s29, 32, %s145_s16, [#allocation12]  }
  0x61   :  { %s4525_s9 = smov [#allocation14]   ;;  %s4526_s26 = smov [#allocation17]  }
  0x62   :  { %s164_s23 = sshll.u32 %s4525_s9, 4  ;;  %s186_s28 = sshll.u32 %s4526_s26, 4  ;;  %s165_s23 = int_to_ptr.vmem [resolvable:$true] %s164_s23  ;;  %s187_s28 = int_to_ptr.vmem [resolvable:$true] %s186_s28 }
  0x63   :  { %s4174_s1 = scalar_lea.vmem %s165_s23, 32  ;;  %p4179_p2 = scmp.lt.s32.totalorder %s165_s23, %s165_s23 }
  0x64   :  { %p4175_p1 = scmp.ne.s32.totalorder %s165_s23, %s4174_s1  ;;  %p4180_p3 = scmp.lt.s32.totalorder %s4174_s1, %s4174_s1 }
  0x66   :  { %p4181_p4 = por %p4180_p3, %p4179_p2 }
  0x68   :  { %p4182_p5 = pnand %p4181_p4, %p4175_p1 }
  0x6a   :  { %4185 = shalt.err (!%p4182_p5)
}
  0x6b   :  { %167 = dma.hbm_to_vmem [thread:$0]  %s4596_s8, 32, %s165_s23, [#allocation15]  }
  0x6c   :  { %s4194_s21 = scalar_lea.vmem %s187_s28, 16  ;;  %s4198_s2 = scalar_lea.vmem %s187_s28, 32 }
  0x6d   :  { %p4195_p6 = scmp.ne.s32.totalorder %s187_s28, %s4194_s21  ;;  %p4199_p7 = scmp.lt.s32.totalorder %s187_s28, %s187_s28 }
  0x6e   :  { %p4200_p8 = scmp.lt.s32.totalorder %s4198_s2, %s4194_s21 }
  0x70   :  { %p4201_p9 = por %p4200_p8, %p4199_p7 }
  0x72   :  { %p4202_p10 = pnand %p4201_p9, %p4195_p6 }
  0x74   :  { %4205 = shalt.err (!%p4202_p10)
}
  0x75   :  { %189 = dma.hbm_to_vmem [thread:$0]  %s4606_s19, 16, %s187_s28, [#allocation18]  }
  0x76   :  { %s4527_s29 = smov [#allocation20]  }
  0x77   :  { %s207_s10 = sshll.u32 %s4527_s29, 4  ;;  %s208_s10 = int_to_ptr.vmem [resolvable:$true] %s207_s10 }
  0x78   :  { %s4214_s11 = scalar_lea.vmem %s208_s10, 1024  ;;  %p4219_p12 = scmp.lt.s32.totalorder %s208_s10, %s208_s10 }
  0x79   :  { %p4215_p11 = scmp.ne.s32.totalorder %s208_s10, %s4214_s11  ;;  %p4220_p13 = scmp.lt.s32.totalorder %s4214_s11, %s4214_s11 }
  0x7b   :  { %p4221_p0 = por %p4220_p13, %p4219_p12 }
  0x7d   :  { %p4222_p1 = pnand %p4221_p0, %p4215_p11 }
  0x7f   :  { %4225 = shalt.err (!%p4222_p1)
}
  0x80   :  { %s4528_s8 = smov 64   ;;  %s4529_s15 = smov 4  }
  0x81   :  { %213 = dma.hbm_to_vmem [thread:$0]  %s4621_s6, 1024, %s208_s10, [#allocation21], %s4528_s8, %s4528_s8, %s4529_s15  }
  0x82   :  { %s4530_s16 = smov [#allocation23]   ;;  %s4531_s19 = smov [#allocation2]  }
  0x83   :  { %s243_s18 = sshll.u32 %s4530_s16, 4  ;;  %s88_s22 = sshll.u32 %s4531_s19, 4  ;;  %s244_s18 = int_to_ptr.vmem [resolvable:$true] %s243_s18  ;;  %s89_s22 = int_to_ptr.vmem [resolvable:$true] %s88_s22 }
  0x84   :  { %s4234_s9 = scalar_lea.vmem %s244_s18, 2048  ;;  %p4239_p3 = scmp.lt.s32.totalorder %s244_s18, %s244_s18 }
  0x85   :  { %p4235_p2 = scmp.ne.s32.totalorder %s244_s18, %s4234_s9  ;;  %p4240_p4 = scmp.lt.s32.totalorder %s4234_s9, %s4234_s9 }
  0x87   :  { %p4241_p5 = por %p4240_p4, %p4239_p3 }
  0x89   :  { %p4242_p6 = pnand %p4241_p5, %p4235_p2 }
  0x8b   :  { %4245 = shalt.err (!%p4242_p6)
}
  0x8c   :  { %s4532_s23 = smov 128   ;;  %s4533_s26 = smov 8  }
  0x8d   :  { %249 = dma.hbm_to_vmem [thread:$0]  %s4661_s30, 2048, %s244_s18, [#allocation24], %s4532_s23, %s4532_s23, %s4533_s26  }
  0x8e   :  { %s4254_s6 = scalar_lea.vmem %s89_s22, 128  ;;  %p4259_p8 = scmp.lt.s32.totalorder %s89_s22, %s89_s22 }
  0x8f   :  { %p4255_p7 = scmp.ne.s32.totalorder %s89_s22, %s4254_s6  ;;  %p4260_p9 = scmp.lt.s32.totalorder %s4254_s6, %s4254_s6 }
  0x91   :  { %p4261_p10 = por %p4260_p9, %p4259_p8 }
  0x93   :  { %p4262_p11 = pnand %p4261_p10, %p4255_p7 }
  0x95   :  { %4265 = shalt.err (!%p4262_p11)
}
  0x96   :  { %91 = dma.hbm_to_vmem [thread:$0]  %s4556_s5, 128, %s89_s22, [#allocation3]  }
  0x97   :  { %s4534_s28 = smov [#allocation7]   ;;  %s4535_s21 = smov [#allocation10]  }
  0x98   :  { %s110_s1 = sshll.u32 %s4534_s28, 4  ;;  %s131_s2 = sshll.u32 %s4535_s21, 4  ;;  %s111_s1 = int_to_ptr.vmem [resolvable:$true] %s110_s1  ;;  %s132_s2 = int_to_ptr.vmem [resolvable:$true] %s131_s2 }
  0x99   :  { %s4274_s29 = scalar_lea.vmem %s111_s1, 64  ;;  %p4279_p13 = scmp.lt.s32.totalorder %s111_s1, %s111_s1 }
  0x9a   :  { %p4275_p12 = scmp.ne.s32.totalorder %s111_s1, %s4274_s29  ;;  %p4280_p0 = scmp.lt.s32.totalorder %s4274_s29, %s4274_s29 }
  0x9c   :  { %p4281_p1 = por %p4280_p0, %p4279_p13 }
  0x9e   :  { %p4282_p2 = pnand %p4281_p1, %p4275_p12 }
  0xa0   :  { %4285 = shalt.err (!%p4282_p2)
}
  0xa1   :  { %113 = dma.hbm_to_vmem [thread:$0]  %s4566_s13, 64, %s111_s1, [#allocation6]  }
  0xa2   :  { %s4294_s30 = scalar_lea.vmem %s132_s2, 8192  ;;  %p4299_p4 = scmp.lt.s32.totalorder %s132_s2, %s132_s2 }
  0xa3   :  { %p4295_p3 = scmp.ne.s32.totalorder %s132_s2, %s4294_s30  ;;  %p4300_p5 = scmp.lt.s32.totalorder %s4294_s30, %s4294_s30 }
  0xa5   :  { %p4301_p6 = por %p4300_p5, %p4299_p4 }
  0xa7   :  { %p4302_p7 = pnand %p4301_p6, %p4295_p3 }
  0xa9   :  { %4305 = shalt.err (!%p4302_p7)
}
  0xaa   :  { %137 = dma.hbm_to_vmem [thread:$0]  %s4581_s25, 8192, %s132_s2, [#allocation9], %s4532_s23, %s4532_s23, %s4533_s26  }
  0xab   :  { %s4536_s5 = smov [#allocation13]   ;;  %s4537_s11 = smov [#allocation16]  }
  0xac   :  { %s154_s10 = sshll.u32 %s4536_s5, 4  ;;  %s173_s16 = sshll.u32 %s4537_s11, 4  ;;  %s155_s10 = int_to_ptr.vmem [resolvable:$true] %s154_s10  ;;  %s174_s16 = int_to_ptr.vmem [resolvable:$true] %s173_s16 }
  0xad   :  { %s4314_s18 = scalar_lea.vmem %s155_s10, 32  ;;  %p4319_p9 = scmp.lt.s32.totalorder %s155_s10, %s155_s10 }
  0xae   :  { %p4315_p8 = scmp.ne.s32.totalorder %s155_s10, %s4314_s18  ;;  %p4320_p10 = scmp.lt.s32.totalorder %s4314_s18, %s4314_s18 }
  0xb0   :  { %p4321_p11 = por %p4320_p10, %p4319_p9 }
  0xb2   :  { %p4322_p12 = pnand %p4321_p11, %p4315_p8 }
  0xb4   :  { %4325 = shalt.err (!%p4322_p12)
}
  0xb5   :  { %157 = dma.hbm_to_vmem [thread:$0]  %s4591_s3, 32, %s155_s10, [#allocation12]  }
  0xb6   :  { %s4334_s13 = scalar_lea.vmem %s174_s16, 2048  ;;  %p4339_p0 = scmp.lt.s32.totalorder %s174_s16, %s174_s16 }
  0xb7   :  { %p4335_p13 = scmp.ne.s32.totalorder %s174_s16, %s4334_s13  ;;  %p4340_p1 = scmp.lt.s32.totalorder %s4334_s13, %s4334_s13 }
  0xb9   :  { %p4341_p2 = por %p4340_p1, %p4339_p0 }
  0xbb   :  { %p4342_p3 = pnand %p4341_p2, %p4335_p13 }
  0xbd   :  { %4345 = shalt.err (!%p4342_p3)
}
  0xbe   :  { %179 = dma.hbm_to_vmem [thread:$0]  %s4601_s14, 2048, %s174_s16, [#allocation15], %s4528_s8, %s4528_s8, %s4529_s15  }
  0xbf   :  { %s4538_s25 = smov [#allocation19]   ;;  %s4539_s22 = smov [#allocation22]  }
  0xc0   :  { %s196_s19 = sshll.u32 %s4538_s25, 4  ;;  %s225_s9 = sshll.u32 %s4539_s22, 4  ;;  %s197_s19 = int_to_ptr.vmem [resolvable:$true] %s196_s19  ;;  %s226_s9 = int_to_ptr.vmem [resolvable:$true] %s225_s9 }
  0xc1   :  { %s4354_s23 = scalar_lea.vmem %s197_s19, 16  ;;  %s4358_s3 = scalar_lea.vmem %s197_s19, 32 }
  0xc2   :  { %p4355_p4 = scmp.ne.s32.totalorder %s197_s19, %s4354_s23  ;;  %p4359_p5 = scmp.lt.s32.totalorder %s197_s19, %s197_s19 }
  0xc3   :  { %p4360_p6 = scmp.lt.s32.totalorder %s4358_s3, %s4354_s23 }
  0xc5   :  { %p4361_p7 = por %p4360_p6, %p4359_p5 }
  0xc7   :  { %p4362_p8 = pnand %p4361_p7, %p4355_p4 }
  0xc9   :  { %4365 = shalt.err (!%p4362_p8)
}
  0xca   :  { %199 = dma.hbm_to_vmem [thread:$0]  %s4611_s24, 16, %s197_s19, [#allocation18]  }
  0xcb   :  { %s4374_s26 = scalar_lea.vmem %s226_s9, 1024  ;;  %p4379_p10 = scmp.lt.s32.totalorder %s226_s9, %s226_s9 }
  0xcc   :  { %p4375_p9 = scmp.ne.s32.totalorder %s226_s9, %s4374_s26  ;;  %p4380_p11 = scmp.lt.s32.totalorder %s4374_s26, %s4374_s26 }
  0xce   :  { %p4381_p12 = por %p4380_p11, %p4379_p10 }
  0xd0   :  { %p4382_p13 = pnand %p4381_p12, %p4375_p9 }
  0xd2   :  { %4385 = shalt.err (!%p4382_p13)
}
  0xd3   :  { %231 = dma.hbm_to_vmem [thread:$0]  %s4641_s4, 1024, %s226_s9, [#allocation21], %s4528_s8, %s4528_s8, %s4529_s15  }
  0xd4   :  { %s4540_s14 = smov [#allocation25]   ;;  %s4541_s28 = smov [#allocation26]  }
  0xd5   :  { %s261_s6 = sshll.u32 %s4540_s14, 4  ;;  %s279_s1 = sshll.u32 %s4541_s28, 4  ;;  %s262_s6 = int_to_ptr.vmem [resolvable:$true] %s261_s6  ;;  %s280_s1 = int_to_ptr.vmem [resolvable:$true] %s279_s1 }
  0xd6   :  { %s4394_s21 = scalar_lea.vmem %s262_s6, 8192  ;;  %p4399_p1 = scmp.lt.s32.totalorder %s262_s6, %s262_s6 }
  0xd7   :  { %p4395_p0 = scmp.ne.s32.totalorder %s262_s6, %s4394_s21  ;;  %p4400_p2 = scmp.lt.s32.totalorder %s4394_s21, %s4394_s21 }
  0xd9   :  { %p4401_p3 = por %p4400_p2, %p4399_p1 }
  0xdb   :  { %p4402_p4 = pnand %p4401_p3, %p4395_p0 }
  0xdd   :  { %4405 = shalt.err (!%p4402_p4)
}
  0xde   :  { %s4967_s24 = sld [smem:[#allocation53_spill]]  ;;  %s4414_s2 = scalar_lea.vmem %s280_s1, 4096 }
  0xdf   :  { %p4415_p5 = scmp.ne.s32.totalorder %s280_s1, %s4414_s2  ;;  %p4419_p6 = scmp.lt.s32.totalorder %s280_s1, %s280_s1 }
  0xe0   :  { %p4420_p7 = scmp.lt.s32.totalorder %s4414_s2, %s4414_s2 }
  0xe2   :  { %p4421_p8 = por %p4420_p7, %p4419_p6 }
  0xe4   :  { %267 = dma.hbm_to_vmem [thread:$0]  %s4967_s24, 8192, %s262_s6, [#allocation24], %s4521_s0, %s4521_s0, %s4522_s7  }
  0xe5   :  { %p4422_p9 = pnand %p4421_p8, %p4415_p5 }
  0xe7   :  { %4425 = shalt.err (!%p4422_p9)
}
  0xe8   :  { %285 = dma.hbm_to_vmem [thread:$0]  %s4701_s17, 4096, %s280_s1, [#allocation27], %s4528_s8, %s4528_s8, %s4529_s15  }
  0xe9   :  { %4466 = dma.done.wait [#allocation3], 128  }
  0xea   :  { %4467 = vsyncadd [#allocation3], 4294967168 }
  0xeb   :  { %4468 = dma.done.wait [#allocation6], 4160  }
  0xec   :  { %4469 = vsyncadd [#allocation6], 4294963136 }
  0xed   :  { %4470 = dma.done.wait [#allocation9], 8256  }
  0xee   :  { %4471 = vsyncadd [#allocation9], 4294959040 }
  0xef   :  { %4472 = dma.done.wait [#allocation12], 64  }
  0xf0   :  { %4473 = vsyncadd [#allocation12], 4294967232 }
  0xf1   :  { %4474 = dma.done.wait [#allocation15], 2080  }
  0xf2   :  { %4475 = vsyncadd [#allocation15], 4294965216 }
  0xf3   :  { %4476 = dma.done.wait [#allocation18], 32  }
  0xf4   :  { %4477 = vsyncadd [#allocation18], 4294967264 }
  0xf5   :  { %4478 = dma.done.wait [#allocation21], 2048  }
  0xf6   :  { %4479 = vsyncadd [#allocation21], 4294965248 }
  0xf7   :  { %4480 = dma.done.wait [#allocation24], 10240  }
  0xf8   :  { %4481 = vsyncadd [#allocation24], 4294957056 }
  0xf9   :  { %4482 = dma.done.wait [#allocation27], 4096  }
  0xfa   :  { %4483 = vsyncadd [#allocation27], 4294963200  ;;  %v4542_v0 = vmov 0   ;;  %v3748_v1 = vld [vmem:[#allocation5 + $0xe4] ss:$16 sps:$4 sm:$0xff]   ;;  %v337_v33 = vld [vmem:[#allocation2] sm:$0xff] }
  0xfb   :  { %585 = vmatprep.mubr.bf16.mxu0 %v4542_v0  ;;  %626 = vmatprep.mubr.bf16.mxu1 %v4542_v0  ;;  %v3750_v2 = vld [vmem:[#allocation5 + $0xec] ss:$16 sps:$4 sm:$0xff]   ;;  %v3752_v3 = vld [vmem:[#allocation5 + $0xe0] ss:$16 sps:$4 sm:$0xff]   ;;  %v3753_v4 = vld [vmem:[#allocation5 + $0xe8] ss:$16 sps:$4 sm:$0xff]   ;;  %v371_v34 = vpack.c.bf16 %v337_v33, %v337_v33 }
  0xfc   :  { %553 = vmatprep.subr.bf16.mxu0 %v3748_v1  ;;  %594 = vmatprep.subr.bf16.mxu1 %v3750_v2  ;;  %v3754_v5 = vld [vmem:[#allocation5 + $0xc4] ss:$16 sps:$4 sm:$0xff]   ;;  %v3756_v6 = vld [vmem:[#allocation5 + $0xcc] ss:$16 sps:$4 sm:$0xff]   ;;  %v3758_v7 = vld [vmem:[#allocation5 + $0xc0] ss:$16 sps:$4 sm:$0xff]  }
  0xfd   :  { %554 = vmatpush1.bf16.msra.mxu0 %v3752_v3  ;;  %595 = vmatpush1.bf16.msra.mxu1 %v3753_v4  ;;  %v3759_v8 = vld [vmem:[#allocation5 + $0xc8] ss:$16 sps:$4 sm:$0xff]   ;;  %v3760_v9 = vld [vmem:[#allocation5 + $0xa4] ss:$16 sps:$4 sm:$0xff]   ;;  %v3762_v10 = vld [vmem:[#allocation5 + $0xac] ss:$16 sps:$4 sm:$0xff]  }
  0xfe   :  { %555 = vmatprep.subr.bf16.mxu0 %v3754_v5  ;;  %596 = vmatprep.subr.bf16.mxu1 %v3756_v6  ;;  %v3764_v11 = vld [vmem:[#allocation5 + $0xa0] ss:$16 sps:$4 sm:$0xff]   ;;  %v3765_v12 = vld [vmem:[#allocation5 + $0xa8] ss:$16 sps:$4 sm:$0xff]   ;;  %v3766_v13 = vld [vmem:[#allocation5 + $0x84] ss:$16 sps:$4 sm:$0xff]  }
  0xff   :  { %v3768_v14 = vld [vmem:[#allocation5 + $0x8c] ss:$16 sps:$4 sm:$0xff]   ;;  %v3770_v15 = vld [vmem:[#allocation5 + $0x80] ss:$16 sps:$4 sm:$0xff]   ;;  %v3771_v16 = vld [vmem:[#allocation5 + $0x88] ss:$16 sps:$4 sm:$0xff]  }
 0x100   :  { %v3772_v17 = vld [vmem:[#allocation5 + $0x64] ss:$16 sps:$4 sm:$0xff]   ;;  %v3774_v18 = vld [vmem:[#allocation5 + $0x6c] ss:$16 sps:$4 sm:$0xff]   ;;  %v3776_v19 = vld [vmem:[#allocation5 + $0x60] ss:$16 sps:$4 sm:$0xff]  }
 0x101   :  { %556 = vmatpush1.bf16.msra.mxu0 %v3758_v7  ;;  %597 = vmatpush1.bf16.msra.mxu1 %v3759_v8  ;;  %v3777_v20 = vld [vmem:[#allocation5 + $0x68] ss:$16 sps:$4 sm:$0xff]   ;;  %v3778_v21 = vld [vmem:[#allocation5 + $0x44] ss:$16 sps:$4 sm:$0xff]   ;;  %v3780_v22 = vld [vmem:[#allocation5 + $0x4c] ss:$16 sps:$4 sm:$0xff]  }
 0x102   :  { %557 = vmatprep.subr.bf16.mxu0 %v3760_v9  ;;  %598 = vmatprep.subr.bf16.mxu1 %v3762_v10  ;;  %v3782_v23 = vld [vmem:[#allocation5 + $0x40] ss:$16 sps:$4 sm:$0xff]   ;;  %v3783_v24 = vld [vmem:[#allocation5 + $0x48] ss:$16 sps:$4 sm:$0xff]   ;;  %v3784_v25 = vld [vmem:[#allocation5 + $0x24] ss:$16 sps:$4 sm:$0xff]  }
 0x103   :  { %v3786_v26 = vld [vmem:[#allocation5 + $0x2c] ss:$16 sps:$4 sm:$0xff]   ;;  %v3788_v27 = vld [vmem:[#allocation5 + $0x20] ss:$16 sps:$4 sm:$0xff]   ;;  %v3789_v28 = vld [vmem:[#allocation5 + $0x28] ss:$16 sps:$4 sm:$0xff]  }
 0x104   :  { %v3790_v29 = vld [vmem:[#allocation5 + $0x4] ss:$16 sps:$4 sm:$0xff]   ;;  %v3792_v30 = vld [vmem:[#allocation5 + $0xc] ss:$16 sps:$4 sm:$0xff]   ;;  %v3794_v31 = vld [vmem:[#allocation5] ss:$16 sps:$4 sm:$0xff]  }
 0x105   :  { %558 = vmatpush1.bf16.msra.mxu0 %v3764_v11  ;;  %599 = vmatpush1.bf16.msra.mxu1 %v3765_v12  ;;  %v3795_v32 = vld [vmem:[#allocation5 + $0x8] ss:$16 sps:$4 sm:$0xff]   ;;  %v3798_v35 = vld [vmem:[#allocation10 + $0x74] ss:$8 sps:$4 sm:$0xff]   ;;  %v3804_v39 = vld [vmem:[#allocation10 + $0x64] ss:$8 sps:$4 sm:$0xff]  }
 0x106   :  { %559 = vmatprep.subr.bf16.mxu0 %v3766_v13  ;;  %600 = vmatprep.subr.bf16.mxu1 %v3768_v14  ;;  %v3801_v36 = vld [vmem:[#allocation10 + $0x174] ss:$8 sps:$4 sm:$0xff]   ;;  %v3796_v37 = vld [vmem:[#allocation10 + $0x70] ss:$8 sps:$4 sm:$0xff]   ;;  %v3807_v40 = vld [vmem:[#allocation10 + $0x164] ss:$8 sps:$4 sm:$0xff]  }
 0x107   :  { %v3799_v38 = vld [vmem:[#allocation10 + $0x170] ss:$8 sps:$4 sm:$0xff]   ;;  %v3802_v41 = vld [vmem:[#allocation10 + $0x60] ss:$8 sps:$4 sm:$0xff]   ;;  %v3810_v43 = vld [vmem:[#allocation10 + $0x54] ss:$8 sps:$4 sm:$0xff]  }
 0x108   :  { %v3805_v42 = vld [vmem:[#allocation10 + $0x160] ss:$8 sps:$4 sm:$0xff]   ;;  %v3813_v44 = vld [vmem:[#allocation10 + $0x154] ss:$8 sps:$4 sm:$0xff]   ;;  %v3808_v45 = vld [vmem:[#allocation10 + $0x50] ss:$8 sps:$4 sm:$0xff]  }
 0x109   :  { %560 = vmatpush1.bf16.msra.mxu0 %v3770_v15  ;;  %601 = vmatpush1.bf16.msra.mxu1 %v3771_v16  ;;  %v3811_v46 = vld [vmem:[#allocation10 + $0x150] ss:$8 sps:$4 sm:$0xff]   ;;  %v3816_v47 = vld [vmem:[#allocation10 + $0x44] ss:$8 sps:$4 sm:$0xff]   ;;  %v3814_v49 = vld [vmem:[#allocation10 + $0x40] ss:$8 sps:$4 sm:$0xff]  }
 0x10a   :  { %561 = vmatprep.subr.bf16.mxu0 %v3772_v17  ;;  %602 = vmatprep.subr.bf16.mxu1 %v3774_v18  ;;  %v3819_v48 = vld [vmem:[#allocation10 + $0x144] ss:$8 sps:$4 sm:$0xff]   ;;  %v3817_v50 = vld [vmem:[#allocation10 + $0x140] ss:$8 sps:$4 sm:$0xff]   ;;  %v3822_v51 = vld [vmem:[#allocation10 + $0x34] ss:$8 sps:$4 sm:$0xff]  }
 0x10b   :  { %v3825_v52 = vld [vmem:[#allocation10 + $0x134] ss:$8 sps:$4 sm:$0xff]   ;;  %v3820_v53 = vld [vmem:[#allocation10 + $0x30] ss:$8 sps:$4 sm:$0xff]   ;;  %v3828_v55 = vld [vmem:[#allocation10 + $0x24] ss:$8 sps:$4 sm:$0xff]  }
 0x10c   :  { %v3823_v54 = vld [vmem:[#allocation10 + $0x130] ss:$8 sps:$4 sm:$0xff]   ;;  %v3831_v56 = vld [vmem:[#allocation10 + $0x124] ss:$8 sps:$4 sm:$0xff]   ;;  %v3826_v57 = vld [vmem:[#allocation10 + $0x20] ss:$8 sps:$4 sm:$0xff]  }
 0x10d   :  { %562 = vmatpush1.bf16.msra.mxu0 %v3776_v19  ;;  %603 = vmatpush1.bf16.msra.mxu1 %v3777_v20  ;;  %v3829_v58 = vld [vmem:[#allocation10 + $0x120] ss:$8 sps:$4 sm:$0xff]   ;;  %v3834_v59 = vld [vmem:[#allocation10 + $0x14] ss:$8 sps:$4 sm:$0xff]   ;;  %v3832_v61 = vld [vmem:[#allocation10 + $0x10] ss:$8 sps:$4 sm:$0xff]  }
 0x10e   :  { %563 = vmatprep.subr.bf16.mxu0 %v3778_v21  ;;  %604 = vmatprep.subr.bf16.mxu1 %v3780_v22  ;;  %v3837_v60 = vld [vmem:[#allocation10 + $0x114] ss:$8 sps:$4 sm:$0xff]   ;;  %v3835_v62 = vld [vmem:[#allocation10 + $0x110] ss:$8 sps:$4 sm:$0xff]   ;;  %v3840_v63 = vld [vmem:[#allocation10 + $0x4] ss:$8 sps:$4 sm:$0xff]  }
 0x10f   :  { %v3843_v1 = vld [vmem:[#allocation10 + $0x104] ss:$8 sps:$4 sm:$0xff]   ;;  %v3838_v2 = vld [vmem:[#allocation10] ss:$8 sps:$4 sm:$0xff]   ;;  %v3846_v4 = vld [vmem:[#allocation10 + $0xf4] ss:$8 sps:$4 sm:$0xff]  }
 0x110   :  { %v3841_v3 = vld [vmem:[#allocation10 + $0x100] ss:$8 sps:$4 sm:$0xff]   ;;  %v3849_v5 = vld [vmem:[#allocation10 + $0x1f4] ss:$8 sps:$4 sm:$0xff]   ;;  %v3844_v6 = vld [vmem:[#allocation10 + $0xf0] ss:$8 sps:$4 sm:$0xff]  }
 0x111   :  { %564 = vmatpush1.bf16.msra.mxu0 %v3782_v23  ;;  %605 = vmatpush1.bf16.msra.mxu1 %v3783_v24  ;;  %v3847_v7 = vld [vmem:[#allocation10 + $0x1f0] ss:$8 sps:$4 sm:$0xff]   ;;  %v3852_v8 = vld [vmem:[#allocation10 + $0xe4] ss:$8 sps:$4 sm:$0xff]   ;;  %v3850_v10 = vld [vmem:[#allocation10 + $0xe0] ss:$8 sps:$4 sm:$0xff]  }
 0x112   :  { %565 = vmatprep.subr.bf16.mxu0 %v3784_v25  ;;  %606 = vmatprep.subr.bf16.mxu1 %v3786_v26  ;;  %v3855_v9 = vld [vmem:[#allocation10 + $0x1e4] ss:$8 sps:$4 sm:$0xff]   ;;  %v3853_v11 = vld [vmem:[#allocation10 + $0x1e0] ss:$8 sps:$4 sm:$0xff]   ;;  %v3858_v12 = vld [vmem:[#allocation10 + $0xd4] ss:$8 sps:$4 sm:$0xff]  }
 0x113   :  { %v3861_v13 = vld [vmem:[#allocation10 + $0x1d4] ss:$8 sps:$4 sm:$0xff]   ;;  %v3856_v14 = vld [vmem:[#allocation10 + $0xd0] ss:$8 sps:$4 sm:$0xff]   ;;  %v3864_v16 = vld [vmem:[#allocation10 + $0xc4] ss:$8 sps:$4 sm:$0xff]  }
 0x114   :  { %v3859_v15 = vld [vmem:[#allocation10 + $0x1d0] ss:$8 sps:$4 sm:$0xff]   ;;  %v3867_v17 = vld [vmem:[#allocation10 + $0x1c4] ss:$8 sps:$4 sm:$0xff]   ;;  %v3862_v18 = vld [vmem:[#allocation10 + $0xc0] ss:$8 sps:$4 sm:$0xff]  }
 0x115   :  { %566 = vmatpush1.bf16.msra.mxu0 %v3788_v27  ;;  %607 = vmatpush1.bf16.msra.mxu1 %v3789_v28  ;;  %v3865_v19 = vld [vmem:[#allocation10 + $0x1c0] ss:$8 sps:$4 sm:$0xff]   ;;  %v3868_v20 = vld [vmem:[#allocation10 + $0xb0] ss:$8 sps:$4 sm:$0xff]   ;;  %v3870_v21 = vld [vmem:[#allocation10 + $0xb4] ss:$8 sps:$4 sm:$0xff]  }
 0x116   :  { %567 = vmatprep.subr.bf16.mxu0 %v3790_v29  ;;  %608 = vmatprep.subr.bf16.mxu1 %v3792_v30  ;;  %v3871_v22 = vld [vmem:[#allocation10 + $0x1b0] ss:$8 sps:$4 sm:$0xff]   ;;  %v3873_v23 = vld [vmem:[#allocation10 + $0x1b4] ss:$8 sps:$4 sm:$0xff]   ;;  %v3876_v24 = vld [vmem:[#allocation10 + $0xa4] ss:$8 sps:$4 sm:$0xff]  }
 0x117   :  { %v3879_v25 = vld [vmem:[#allocation10 + $0x1a4] ss:$8 sps:$4 sm:$0xff]   ;;  %v3874_v26 = vld [vmem:[#allocation10 + $0xa0] ss:$8 sps:$4 sm:$0xff]   ;;  %v3882_v28 = vld [vmem:[#allocation10 + $0x94] ss:$8 sps:$4 sm:$0xff]  }
 0x118   :  { %v3877_v27 = vld [vmem:[#allocation10 + $0x1a0] ss:$8 sps:$4 sm:$0xff]   ;;  %v3885_v29 = vld [vmem:[#allocation10 + $0x194] ss:$8 sps:$4 sm:$0xff]   ;;  %v3880_v30 = vld [vmem:[#allocation10 + $0x90] ss:$8 sps:$4 sm:$0xff]  }
 0x119   :  { %568 = vmatpush1.bf16.msra.mxu0 %v3794_v31  ;;  %609 = vmatpush1.bf16.msra.mxu1 %v3795_v32  ;;  %v3883_v31 = vld [vmem:[#allocation10 + $0x190] ss:$8 sps:$4 sm:$0xff]   ;;  %v3888_v32 = vld [vmem:[#allocation10 + $0x84] ss:$8 sps:$4 sm:$0xff]   ;;  %s4968_s17 = sld [smem:[#allocation42_spill]]  ;;  %vm4545_vm6 = vmmov 0  }
 0x11a   :  { %1236 = vmatprep.subr.bf16.mxu0 %v3798_v35  ;;  %1277 = vmatprep.subr.bf16.mxu1 %v3801_v36  ;;  %v3891_v33 = vld [vmem:[#allocation10 + $0x184] ss:$8 sps:$4 sm:$0xff]   ;;  %v3889_v35 = vld [vmem:[#allocation10 + $0x180] ss:$8 sps:$4 sm:$0xff]   ;;  %v373_v36 = vlaneseq  ;;  %s4969_s4 = sld [smem:[#allocation43_spill]]  ;;  %s4546_s25 = smov [#allocation28]  }
 0x11b   :  { %s4970_s0 = sld [smem:[#allocation44_spill]]  ;;  %s3257_s19 = sshll.u32 %s4546_s25, 4  ;;  %s3258_s19 = int_to_ptr.vmem [resolvable:$true] %s3257_s19 }
 0x11c   :  { %586 = vmatmul.mubr.bf16.vlgmr.msra.gmra.mxu0 %v371_v34  ;;  %627 = vmatmul.mubr.bf16.vlgmr.msra.gmra.mxu1 %v371_v34  ;;  %v3886_v34 = vld [vmem:[#allocation10 + $0x80] ss:$8 sps:$4 sm:$0xff]   ;;  %s4971_s7 = sld [smem:[#allocation45_spill]]  ;;  %s4426_s22 = scalar_lea.vmem %s3258_s19, 128 }
 0x11d   :  { %1237 = vmatpush1.bf16.msra.mxu0 %v3796_v37  ;;  %1278 = vmatpush1.bf16.msra.mxu1 %v3799_v38  ;;  %v4760_v37 = vshrl.u32 %v373_v36, 7  ;;  %s4972_s8 = sld [smem:[#allocation46_spill]]  ;;  %p4427_p10 = scmp.ne.s32.totalorder %s3258_s19, %s4426_s22 }
 0x11e   :  { %1238 = vmatprep.subr.bf16.mxu0 %v3804_v39  ;;  %1279 = vmatprep.subr.bf16.mxu1 %v3807_v40  ;;  %v370_v40 = vld [vmem:[#allocation7] sm:$0xf]  ;;  %s4973_s15 = sld [smem:[#allocation47_spill]]  ;;  %p4431_p11 = scmp.lt.s32.totalorder %s3258_s19, %s3258_s19 }
 0x11f   :  { %v4763_v38 = vsub.s32 0, %v4760_v37  ;;  %v4766_v39 = vsub.s32 2, %v4760_v37  ;;  %s4974_s29 = sld [smem:[#allocation48_spill]]  ;;  %p4432_p12 = scmp.lt.s32.totalorder %s4426_s22, %s4426_s22 }
 0x120   :  { %s4975_s30 = sld [smem:[#allocation49_spill]] }
 0x121   :  { %1239 = vmatpush1.bf16.msra.mxu0 %v3802_v41  ;;  %1280 = vmatpush1.bf16.msra.mxu1 %v3805_v42  ;;  %v4769_v41 = vsub.s32 1, %v4760_v37  ;;  %v4772_v42 = vsub.s32 3, %v4760_v37  ;;  %s4976_s5 = sld [smem:[#allocation50_spill]]  ;;  %p4433_p13 = por %p4432_p12, %p4431_p11 }
 0x122   :  { %1240 = vmatprep.subr.bf16.mxu0 %v3810_v43  ;;  %1281 = vmatprep.subr.bf16.mxu1 %v3813_v44  ;;  %v376_v43 = vrot.slane %v370_v40, %v4763_v38  ;;  %v384_v44 = vrot.slane %v370_v40, %v4766_v39  ;;  %s4977_s10 = sld [smem:[#allocation51_spill]] }
 0x123   :  { %s4978_s11 = sld [smem:[#allocation52_spill]]  ;;  %p4434_p0 = pnand %p4433_p13, %p4427_p10 }
 0x124   :  { %s4979_s16 = sld [smem:[#allocation54_spill]] }
 0x125   :  { %1241 = vmatpush1.bf16.msra.mxu0 %v3808_v45  ;;  %1282 = vmatpush1.bf16.msra.mxu1 %v3811_v46  ;;  %v380_v45 = vrot.slane %v370_v40, %v4769_v41  ;;  %v388_v46 = vrot.slane %v370_v40, %v4772_v42  ;;  %s4980_s18 = sld [smem:[#allocation55_spill]] }
 0x126   :  { %1242 = vmatprep.subr.bf16.mxu0 %v3816_v47  ;;  %1283 = vmatprep.subr.bf16.mxu1 %v3819_v48  ;;  %s4981_s13 = sld [smem:[#allocation56_spill]] }
 0x129   :  { %1243 = vmatpush1.bf16.msra.mxu0 %v3814_v49  ;;  %1284 = vmatpush1.bf16.msra.mxu1 %v3817_v50 }
 0x12a   :  { %1244 = vmatprep.subr.bf16.mxu0 %v3822_v51  ;;  %1285 = vmatprep.subr.bf16.mxu1 %v3825_v52 }
 0x12d   :  { %1245 = vmatpush1.bf16.msra.mxu0 %v3820_v53  ;;  %1286 = vmatpush1.bf16.msra.mxu1 %v3823_v54 }
 0x12e   :  { %1246 = vmatprep.subr.bf16.mxu0 %v3828_v55  ;;  %1287 = vmatprep.subr.bf16.mxu1 %v3831_v56 }
 0x131   :  { %1247 = vmatpush1.bf16.msra.mxu0 %v3826_v57  ;;  %1288 = vmatpush1.bf16.msra.mxu1 %v3829_v58 }
 0x132   :  { %1248 = vmatprep.subr.bf16.mxu0 %v3834_v59  ;;  %1289 = vmatprep.subr.bf16.mxu1 %v3837_v60 }
 0x135   :  { %1249 = vmatpush1.bf16.msra.mxu0 %v3832_v61  ;;  %1290 = vmatpush1.bf16.msra.mxu1 %v3835_v62 }
 0x136   :  { %1250 = vmatprep.subr.bf16.mxu0 %v3840_v63  ;;  %1291 = vmatprep.subr.bf16.mxu1 %v3843_v1 }
 0x139   :  { %1251 = vmatpush1.bf16.msra.mxu0 %v3838_v2  ;;  %1292 = vmatpush1.bf16.msra.mxu1 %v3841_v3 }
 0x13a   :  { %1252 = vmatprep.subr.bf16.mxu0 %v3846_v4  ;;  %1293 = vmatprep.subr.bf16.mxu1 %v3849_v5 }
 0x13d   :  { %1253 = vmatpush2.bf16.msra.mxu0 %v3844_v6  ;;  %1294 = vmatpush2.bf16.msra.mxu1 %v3847_v7 }
 0x13e   :  { %1254 = vmatprep.subr.bf16.mxu0 %v3852_v8  ;;  %1295 = vmatprep.subr.bf16.mxu1 %v3855_v9 }
 0x141   :  { %1255 = vmatpush2.bf16.msra.mxu0 %v3850_v10  ;;  %1296 = vmatpush2.bf16.msra.mxu1 %v3853_v11 }
 0x142   :  { %1256 = vmatprep.subr.bf16.mxu0 %v3858_v12  ;;  %1297 = vmatprep.subr.bf16.mxu1 %v3861_v13 }
 0x145   :  { %1257 = vmatpush2.bf16.msra.mxu0 %v3856_v14  ;;  %1298 = vmatpush2.bf16.msra.mxu1 %v3859_v15 }
 0x146   :  { %1258 = vmatprep.subr.bf16.mxu0 %v3864_v16  ;;  %1299 = vmatprep.subr.bf16.mxu1 %v3867_v17 }
 0x149   :  { %1259 = vmatpush2.bf16.msra.mxu0 %v3862_v18  ;;  %1300 = vmatpush2.bf16.msra.mxu1 %v3865_v19 }
 0x14a   :  { %1260 = vmatprep.subr.bf16.mxu0 %v3870_v21  ;;  %1301 = vmatprep.subr.bf16.mxu1 %v3873_v23 }
 0x14d   :  { %1261 = vmatpush2.bf16.msra.mxu0 %v3868_v20  ;;  %1302 = vmatpush2.bf16.msra.mxu1 %v3871_v22 }
 0x14e   :  { %1262 = vmatprep.subr.bf16.mxu0 %v3876_v24  ;;  %1303 = vmatprep.subr.bf16.mxu1 %v3879_v25 }
 0x151   :  { %1263 = vmatpush2.bf16.msra.mxu0 %v3874_v26  ;;  %1304 = vmatpush2.bf16.msra.mxu1 %v3877_v27 }
 0x152   :  { %1264 = vmatprep.subr.bf16.mxu0 %v3882_v28  ;;  %1305 = vmatprep.subr.bf16.mxu1 %v3885_v29 }
 0x155   :  { %1265 = vmatpush2.bf16.msra.mxu0 %v3880_v30  ;;  %1306 = vmatpush2.bf16.msra.mxu1 %v3883_v31 }
 0x156   :  { %1266 = vmatprep.subr.bf16.mxu0 %v3888_v32  ;;  %1307 = vmatprep.subr.bf16.mxu1 %v3891_v33 }
 0x159   :  { %1267 = vmatpush2.bf16.msra.mxu0 %v3886_v34  ;;  %1308 = vmatpush2.bf16.msra.mxu1 %v3889_v35 }
 0x1dc   :  { %v587_v47 = vpop.f32.mrf.mxu0  ;;  %v628_v48 = vpop.f32.mrf.mxu1 }
 0x1dd   :  { %v4778_v49 = vadd.f32 %v587_v47, %v376_v43  ;;  %v4780_v50 = vadd.f32 %v628_v48, %v384_v44 }
 0x1de   :  { %v589_v51 = vpop.f32.mrf.mxu0  ;;  %v630_v52 = vpop.f32.mrf.mxu1 }
 0x1df   :  { %v637_v53 = vrot.slane %v4778_v49, 4  ;;  %v649_v54 = vrot.slane %v4780_v50, 4  ;;  %v4784_v55 = vadd.f32 %v589_v51, %v380_v45  ;;  %v4786_v56 = vadd.f32 %v630_v52, %v388_v46 }
 0x1e0   :  { %v591_v57 = vpop.f32.mrf.mxu0  ;;  %v632_v58 = vpop.f32.mrf.mxu1 }
 0x1e1   :  { %v638_v59 = vadd.f32 %v637_v53, %v4778_v49  ;;  %v650_v60 = vadd.f32 %v649_v54, %v4780_v50  ;;  %v643_v61 = vrot.slane %v4784_v55, 4  ;;  %v655_v62 = vrot.slane %v4786_v56, 4 }
 0x1e2   :  { %v592_v63 = vpop.f32.mrf.mxu0  ;;  %v633_v1 = vpop.f32.mrf.mxu1 }
 0x1e3   :  { %v639_v2 = vrot.slane %v638_v59, 2  ;;  %v651_v3 = vrot.slane %v650_v60, 2  ;;  %v644_v4 = vadd.f32 %v643_v61, %v4784_v55  ;;  %v656_v5 = vadd.f32 %v655_v62, %v4786_v56 }
 0x1e5   :  { %v640_v6 = vadd.f32 %v639_v2, %v638_v59  ;;  %v652_v7 = vadd.f32 %v651_v3, %v650_v60  ;;  %v645_v8 = vrot.slane %v644_v4, 2  ;;  %v657_v9 = vrot.slane %v656_v5, 2 }
 0x1e7   :  { %v641_v10 = vrot.slane %v640_v6, 1  ;;  %v653_v11 = vrot.slane %v652_v7, 1  ;;  %v646_v12 = vadd.f32 %v645_v8, %v644_v4  ;;  %v658_v13 = vadd.f32 %v657_v9, %v656_v5 }
 0x1e9   :  { %v642_v14 = vadd.f32 %v641_v10, %v640_v6  ;;  %v654_v15 = vadd.f32 %v653_v11, %v652_v7  ;;  %v647_v16 = vrot.slane %v646_v12, 1  ;;  %v659_v17 = vrot.slane %v658_v13, 1 }
 0x1ea   :  { %v4543_v10 = vmov 1966171168  }
 0x1eb   :  { %v4794_v18 = vmul.f32 0.125, %v642_v14  ;;  %v4796_v19 = vmul.f32 0.125, %v654_v15  ;;  %v648_v20 = vadd.f32 %v647_v16, %v646_v12  ;;  %v660_v21 = vadd.f32 %v659_v17, %v658_v13 }
 0x1ec   :  { %v717_v11 = vunpack.c.l.s4 %v4543_v10  ;;  %v3895_v10 = vld [vmem:[#allocation16 + $0x30] sm:$0xff]  }
 0x1ed   :  { %v666_v22 = vsub.f32 %v4778_v49, %v4794_v18  ;;  %v668_v23 = vsub.f32 %v4780_v50, %v4796_v19  ;;  %v4802_v24 = vmul.f32 0.125, %v648_v20  ;;  %v4804_v25 = vmul.f32 0.125, %v660_v21 }
 0x1ee   :  { %v718_v12 = vunpack.c.0.s8 %v717_v11  ;;  %v3896_v11 = vld [vmem:[#allocation16 + $0x68] sm:$0xff]  }
 0x1ef   :  { %v670_v26 = vmul.f32 %v666_v22, %v666_v22  ;;  %v672_v27 = vmul.f32 %v668_v23, %v668_v23  ;;  %v667_v28 = vsub.f32 %v4784_v55, %v4802_v24  ;;  %v669_v29 = vsub.f32 %v4786_v56, %v4804_v25 }
 0x1f0   :  { %v4811_v15 = vsub.s32 %v718_v12, %v4760_v37  ;;  %v3897_v12 = vld [vmem:[#allocation16 + $0x28] sm:$0xff]  }
 0x1f1   :  { %v674_v30 = vrot.slane %v670_v26, 4  ;;  %v686_v31 = vrot.slane %v672_v27, 4  ;;  %v671_v32 = vmul.f32 %v667_v28, %v667_v28  ;;  %v673_v33 = vmul.f32 %v669_v29, %v669_v29 }
 0x1f3   :  { %v675_v34 = vadd.f32 %v674_v30, %v670_v26  ;;  %v687_v35 = vadd.f32 %v686_v31, %v672_v27  ;;  %v680_v36 = vrot.slane %v671_v32, 4  ;;  %v692_v40 = vrot.slane %v673_v33, 4  ;;  %v635_v27 = vld [vmem:[%s4968_s17] sm:$0xf] }
 0x1f5   :  { %v676_v43 = vrot.slane %v675_v34, 2  ;;  %v688_v44 = vrot.slane %v687_v35, 2  ;;  %v681_v45 = vadd.f32 %v680_v36, %v671_v32  ;;  %v693_v46 = vadd.f32 %v692_v40, %v673_v33 }
 0x1f7   :  { %v677_v47 = vadd.f32 %v676_v43, %v675_v34  ;;  %v689_v48 = vadd.f32 %v688_v44, %v687_v35  ;;  %v682_v51 = vrot.slane %v681_v45, 2  ;;  %v694_v52 = vrot.slane %v693_v46, 2 }
 0x1f9   :  { %v678_v53 = vrot.slane %v677_v47, 1  ;;  %v690_v54 = vrot.slane %v689_v48, 1  ;;  %v683_v57 = vadd.f32 %v682_v51, %v681_v45  ;;  %v695_v58 = vadd.f32 %v694_v52, %v693_v46 }
 0x1fb   :  { %v679_v59 = vadd.f32 %v678_v53, %v677_v47  ;;  %v691_v60 = vadd.f32 %v690_v54, %v689_v48  ;;  %v684_v61 = vrot.slane %v683_v57, 1  ;;  %v696_v62 = vrot.slane %v695_v58, 1  ;;  %v636_v47 = vld [vmem:[#allocation8] sm:$0xf] }
 0x1fd   :  { %v698_v63 = vmul.f32 0.125, %v679_v59  ;;  %v700_v1 = vmul.f32 0.125, %v691_v60  ;;  %v685_v2 = vadd.f32 %v684_v61, %v683_v57  ;;  %v697_v3 = vadd.f32 %v696_v62, %v695_v58 }
 0x1ff   :  { %v702_v4 = vadd.f32 1e-05, %v698_v63  ;;  %v704_v5 = vadd.f32 1e-05, %v700_v1  ;;  %v699_v6 = vmul.f32 0.125, %v685_v2  ;;  %v701_v7 = vmul.f32 0.125, %v697_v3 }
 0x201   :  { %4076 = vrsqrt.f32 %v702_v4  ;;  %v703_v8 = vadd.f32 1e-05, %v699_v6  ;;  %v705_v9 = vadd.f32 1e-05, %v701_v7  ;;  %v3892_v7 = vld [vmem:[#allocation16 + $0x78] sm:$0xff]  }
 0x202   :  { %4078 = vrsqrt.f32 %v704_v5  ;;  %3564 = vmatprep.subr.bf16.mxu0 %v3892_v7 }
 0x203   :  { %4080 = vrsqrt.f32 %v703_v8  ;;  %v3893_v8 = vld [vmem:[#allocation16 + $0x38] sm:$0xff]  }
 0x204   :  { %4082 = vrsqrt.f32 %v705_v9  ;;  %v3894_v9 = vld [vmem:[#allocation16 + $0x70] sm:$0xff]  }
 0x20e   :  { %v4077_v13 = vpop.eup %4076 }
 0x20f   :  { %v4079_v14 = vpop.eup %4078 }
 0x210   :  { %v4081_v16 = vpop.eup %4080 }
 0x211   :  { %v4083_v17 = vpop.eup %4082  ;;  %v714_v20 = vcombine.low %v4077_v13, %v4081_v16  ;;  %v3898_v13 = vld [vmem:[#allocation16 + $0x60] sm:$0xff]   ;;  %v3900_v16 = vld [vmem:[#allocation16 + $0x58] sm:$0xff]  }
 0x212   :  { %v715_v21 = vcombine.low %v4079_v14, %v4083_v17  ;;  %v3899_v14 = vld [vmem:[#allocation16 + $0x20] sm:$0xff]   ;;  %v3901_v17 = vld [vmem:[#allocation16 + $0x18] sm:$0xff]  }
 0x213   :  { %v722_v22 = vrot.slane %v714_v20, %v4811_v15  ;;  %v3902_v20 = vld [vmem:[#allocation16 + $0x50] sm:$0xff]  }
 0x214   :  { %v729_v23 = vrot.slane %v715_v21, %v4811_v15  ;;  %v3903_v21 = vld [vmem:[#allocation16 + $0x10] sm:$0xff]  }
 0x216   :  { %v730_v26 = vcombine.low %v722_v22, %v729_v23  ;;  %v3904_v22 = vld [vmem:[#allocation16 + $0x48] sm:$0xff]  }
 0x217   :  { %v3905_v23 = vld [vmem:[#allocation16 + $0x8] sm:$0xff]  }
 0x218   :  { %v737_v28 = vrot.slane %v730_v26, %v4811_v15  ;;  %v3906_v26 = vld [vmem:[#allocation16 + $0x40] sm:$0xff]  }
 0x21a   :  { %v739_v29 = vmul.f32 %v737_v28, %v635_v27  ;;  %v3907_v27 = vld [vmem:[#allocation16] sm:$0xff]   ;;  %v900_v28 = vld [vmem:[#allocation11] sm:$0x3] }
 0x21c   :  { %v752_v30 = vrot.slane %v739_v29, %v4766_v39  ;;  %v756_v31 = vrot.slane %v739_v29, %v4772_v42  ;;  %v744_v37 = vrot.slane %v739_v29, %v4763_v38  ;;  %v748_v32 = vrot.slane %v739_v29, %v4769_v41 }
 0x21d   :  { %v909_v29 = vrot.slane %v900_v28, %v4763_v38 }
 0x21e   :  { %v763_v33 = vmul.f32 %v752_v30, %v4796_v19  ;;  %v764_v34 = vmul.f32 %v756_v31, %v4804_v25  ;;  %v761_v35 = vmul.f32 %v744_v37, %v4794_v18  ;;  %v762_v36 = vmul.f32 %v748_v32, %v4802_v24 }
 0x21f   :  { %v798_v52 = vmul.f32 %v756_v31, %v4786_v56  ;;  %v796_v19 = vmul.f32 %v748_v32, %v4784_v55  ;;  %v795_v25 = vmul.f32 %v744_v37, %v4778_v49  ;;  %v797_v18 = vmul.f32 %v752_v30, %v4780_v50 }
 0x220   :  { %v770_v40 = vcombine.low %v763_v33, %v764_v34  ;;  %v769_v43 = vcombine.low %v761_v35, %v762_v36  ;;  %v913_v30 = vrot.slane %v900_v28, %v4769_v41 }
 0x222   :  { %v784_v44 = vrot.slane %v770_v40, %v4811_v15  ;;  %v777_v45 = vrot.slane %v769_v43, %v4811_v15 }
 0x224   :  { %v785_v46 = vcombine.low %v777_v45, %v784_v44 }
 0x226   :  { %v792_v48 = vrot.slane %v785_v46, %v4811_v15 }
 0x228   :  { %v794_v51 = vsub.f32 %v636_v47, %v792_v48 }
 0x22a   :  { %v807_v24 = vrot.slane %v794_v51, %v4769_v41  ;;  %v815_v53 = vrot.slane %v794_v51, %v4772_v42  ;;  %v803_v54 = vrot.slane %v794_v51, %v4763_v38  ;;  %v811_v57 = vrot.slane %v794_v51, %v4766_v39 }
 0x22c   :  { %v821_v58 = vadd.f32 %v807_v24, %v796_v19  ;;  %v823_v59 = vadd.f32 %v815_v53, %v798_v52  ;;  %v820_v60 = vadd.f32 %v803_v54, %v795_v25  ;;  %v822_v61 = vadd.f32 %v811_v57, %v797_v18 }
 0x22e   :  { %vm825_vm0 = vcmp.ge.f32.partialorder %v821_v58, 0.0  ;;  %v829_v56 = vmul.f32 0.01, %v821_v58  ;;  %vm827_vm1 = vcmp.ge.f32.partialorder %v823_v59, 0.0  ;;  %v831_v55 = vmul.f32 0.01, %v823_v59 }
 0x22f   :  { %vm824_vm2 = vcmp.ge.f32.partialorder %v820_v60, 0.0  ;;  %v828_v49 = vmul.f32 0.01, %v820_v60  ;;  %vm826_vm3 = vcmp.ge.f32.partialorder %v822_v61, 0.0  ;;  %v830_v50 = vmul.f32 0.01, %v822_v61 }
 0x230   :  { %v833_v62 = vsel %vm825_vm0, %v821_v58, %v829_v56  ;;  %v835_v63 = vsel %vm827_vm1, %v823_v59, %v831_v55 }
 0x231   :  { %v902_v1 = vpack.c.bf16 %v833_v62, %v833_v62  ;;  %v904_v2 = vpack.c.bf16 %v835_v63, %v835_v63  ;;  %v832_v3 = vsel %vm824_vm2, %v820_v60, %v828_v49  ;;  %v834_v4 = vsel %vm826_vm3, %v822_v61, %v830_v50 }
 0x232   :  { %v901_v5 = vpack.c.bf16 %v832_v3, %v832_v3  ;;  %v903_v6 = vpack.c.bf16 %v834_v4, %v834_v4 }
 0x233   :  { %1268 = vmatprep.mubr.bf16.mxu0 %v902_v1  ;;  %1309 = vmatprep.mubr.bf16.mxu1 %v904_v2 }
 0x234   :  { %1269 = vmatmul.mubr.bf16.vlgmr.msra.gmra.mxu0 %v901_v5  ;;  %1310 = vmatmul.mubr.bf16.vlgmr.msra.gmra.mxu1 %v903_v6 }
 0x235   :  { %3565 = vmatpush3.bf16.msra.mxu0 %v3893_v8 }
 0x236   :  { %3566 = vmatprep.subr.bf16.mxu0 %v3894_v9 }
 0x239   :  { %3567 = vmatpush3.bf16.msra.mxu0 %v3895_v10 }
 0x23a   :  { %3568 = vmatprep.subr.bf16.mxu0 %v3896_v11 }
 0x23d   :  { %3569 = vmatpush3.bf16.msra.mxu0 %v3897_v12 }
 0x23e   :  { %3570 = vmatprep.subr.bf16.mxu0 %v3898_v13 }
 0x241   :  { %3571 = vmatpush3.bf16.msra.mxu0 %v3899_v14 }
 0x242   :  { %3572 = vmatprep.subr.bf16.mxu0 %v3900_v16 }
 0x245   :  { %3573 = vmatpush3.bf16.msra.mxu0 %v3901_v17 }
 0x246   :  { %3574 = vmatprep.subr.bf16.mxu0 %v3902_v20 }
 0x249   :  { %3575 = vmatpush3.bf16.msra.mxu0 %v3903_v21  ;;  %v1318_v21 = vld [vmem:[#allocation13] sm:$0x3] }
 0x24a   :  { %3576 = vmatprep.subr.bf16.mxu0 %v3904_v22 }
 0x24d   :  { %3577 = vmatpush3.bf16.msra.mxu0 %v3905_v23 }
 0x24e   :  { %3578 = vmatprep.subr.bf16.mxu0 %v3906_v26 }
 0x251   :  { %3579 = vmatpush3.bf16.msra.mxu0 %v3907_v27 }
 0x2f4   :  { %v1270_v31 = vpop.f32.mrf.mxu0  ;;  %v1311_v37 = vpop.f32.mrf.mxu1 }
 0x2f5   :  { %v1271_v32 = vadd.f32 %v1270_v31, %v909_v29 }
 0x2f6   :  { %v1272_v33 = vpop.f32.mrf.mxu0  ;;  %v1313_v34 = vpop.f32.mrf.mxu1 }
 0x2f7   :  { %v1312_v35 = vadd.f32 %v1311_v37, %v1271_v32  ;;  %v1273_v36 = vadd.f32 %v1272_v33, %v913_v30  ;;  %v1319_v37 = vld [vmem:[#allocation14] sm:$0x3] }
 0x2f8   :  { %v1274_v40 = vpop.f32.mrf.mxu0  ;;  %v1315_v43 = vpop.f32.mrf.mxu1 }
 0x2f9   :  { %v1320_v44 = vrot.slane %v1312_v35, 4  ;;  %v1314_v45 = vadd.f32 %v1313_v34, %v1273_v36 }
 0x2fa   :  { %v1275_v46 = vpop.f32.mrf.mxu0  ;;  %v1316_v47 = vpop.f32.mrf.mxu1 }
 0x2fb   :  { %v1321_v48 = vadd.f32 %v1320_v44, %v1312_v35  ;;  %v1326_v51 = vrot.slane %v1314_v45, 4 }
 0x2fd   :  { %v1322_v52 = vrot.slane %v1321_v48, 2  ;;  %v1327_v19 = vadd.f32 %v1326_v51, %v1314_v45 }
 0x2ff   :  { %v1323_v25 = vadd.f32 %v1322_v52, %v1321_v48  ;;  %v1328_v18 = vrot.slane %v1327_v19, 2 }
 0x301   :  { %v1324_v24 = vrot.slane %v1323_v25, 1  ;;  %v1329_v53 = vadd.f32 %v1328_v18, %v1327_v19  ;;  %v3908_v18 = vld [vmem:[#allocation20 + $0x38] sm:$0xff]  }
 0x303   :  { %v1325_v54 = vadd.f32 %v1324_v24, %v1323_v25  ;;  %v1330_v57 = vrot.slane %v1329_v53, 1  ;;  %v4544_v24 = vmov 0.0  }
 0x304   :  { %3648 = vmatprep.subr.bf16.mxu1 %v4544_v24  ;;  %3668 = vmatprep.subr.bf16.mxu0 %v4544_v24 }
 0x305   :  { %v1332_v58 = vmul.f32 0.125, %v1325_v54  ;;  %v1331_v59 = vadd.f32 %v1330_v57, %v1329_v53  ;;  %3649 = vmatpush3.bf16.msra.mxu1 %v3908_v18  ;;  %v3911_v53 = vld [vmem:[#allocation20 + $0x20] sm:$0xff]   ;;  %v3912_v54 = vld [vmem:[#allocation20 + $0x18] sm:$0xff]   ;;  %v3913_v57 = vld [vmem:[#allocation20 + $0x10] sm:$0xff]   ;;  %3664 = vmatprep.mubr.msk.bf16.mxu1 %vm4545_vm6, %v4544_v24 }
 0x306   :  { %3650 = vmatprep.subr.bf16.mxu1 %v4544_v24 }
 0x307   :  { %v1334_v60 = vsub.f32 %v1312_v35, %v1332_v58  ;;  %v1333_v61 = vmul.f32 0.125, %v1331_v59  ;;  %v3915_v59 = vld [vmem:[#allocation20] sm:$0xff]  }
 0x309   :  { %v1336_v56 = vmul.f32 %v1334_v60, %v1334_v60  ;;  %v1335_v55 = vsub.f32 %v1314_v45, %v1333_v61 }
 0x30b   :  { %v1338_v49 = vrot.slane %v1336_v56, 4  ;;  %v1337_v50 = vmul.f32 %v1335_v55, %v1335_v55 }
 0x30d   :  { %v1339_v62 = vadd.f32 %v1338_v49, %v1336_v56  ;;  %v1344_v63 = vrot.slane %v1337_v50, 4 }
 0x30f   :  { %v1340_v1 = vrot.slane %v1339_v62, 2  ;;  %v1345_v2 = vadd.f32 %v1344_v63, %v1337_v50 }
 0x311   :  { %v1341_v3 = vadd.f32 %v1340_v1, %v1339_v62  ;;  %v1346_v4 = vrot.slane %v1345_v2, 2 }
 0x313   :  { %v1342_v5 = vrot.slane %v1341_v3, 1  ;;  %v1347_v6 = vadd.f32 %v1346_v4, %v1345_v2 }
 0x315   :  { %v1343_v7 = vadd.f32 %v1342_v5, %v1341_v3  ;;  %v1348_v8 = vrot.slane %v1347_v6, 1 }
 0x317   :  { %v1350_v9 = vmul.f32 0.125, %v1343_v7  ;;  %v1349_v10 = vadd.f32 %v1348_v8, %v1347_v6 }
 0x319   :  { %v1352_v11 = vadd.f32 1e-05, %v1350_v9  ;;  %v1351_v12 = vmul.f32 0.125, %v1349_v10 }
 0x31b   :  { %v1353_v13 = vadd.f32 1e-05, %v1351_v12  ;;  %4084 = vrsqrt.f32 %v1352_v11 }
 0x31d   :  { %4086 = vrsqrt.f32 %v1353_v13 }
 0x328   :  { %v4085_v14 = vpop.eup %4084 }
 0x32a   :  { %v4087_v16 = vpop.eup %4086 }
 0x32b   :  { %v1358_v17 = vcombine.low %v4085_v14, %v4087_v16 }
 0x32d   :  { %v1365_v20 = vrot.slane %v1358_v17, %v4811_v15 }
 0x32f   :  { %v1372_v22 = vrot.slane %v1365_v20, %v4811_v15  ;;  %v1605_v20 = vld [vmem:[#allocation19] sm:$0x1] }
 0x331   :  { %v1374_v23 = vmul.f32 %v1372_v22, %v1318_v21 }
 0x333   :  { %v1379_v26 = vrot.slane %v1374_v23, %v4763_v38  ;;  %v1383_v27 = vrot.slane %v1374_v23, %v4769_v41  ;;  %v1606_v23 = vld [vmem:[%s4969_s4] sm:$0x1] }
 0x335   :  { %v1386_v28 = vmul.f32 %v1379_v26, %v1332_v58  ;;  %v1387_v29 = vmul.f32 %v1383_v27, %v1333_v61  ;;  %v1408_v34 = vmul.f32 %v1383_v27, %v1314_v45  ;;  %v1407_v40 = vmul.f32 %v1379_v26, %v1312_v35  ;;  %v3909_v35 = vld [vmem:[#allocation20 + $0x30] sm:$0xff]   ;;  %v3910_v45 = vld [vmem:[#allocation20 + $0x28] sm:$0xff]   ;;  %v3416_v61 = vld [vmem:[#allocation17] ss:$0 sm:$0xff] }
 0x336   :  { %3651 = vmatpush3.bf16.msra.mxu1 %v3909_v35  ;;  %v3914_v58 = vld [vmem:[#allocation20 + $0x8] sm:$0xff]  }
 0x337   :  { %v1390_v30 = vcombine.low %v1386_v28, %v1387_v29  ;;  %3652 = vmatprep.subr.bf16.mxu1 %v4544_v24 }
 0x339   :  { %v1397_v31 = vrot.slane %v1390_v30, %v4811_v15 }
 0x33a   :  { %3653 = vmatpush3.bf16.msra.mxu1 %v3910_v45 }
 0x33b   :  { %v1404_v32 = vrot.slane %v1397_v31, %v4811_v15  ;;  %3654 = vmatprep.subr.bf16.mxu1 %v4544_v24 }
 0x33d   :  { %v1406_v33 = vsub.f32 %v1319_v37, %v1404_v32 }
 0x33e   :  { %3655 = vmatpush3.bf16.msra.mxu1 %v3911_v53 }
 0x33f   :  { %v1417_v36 = vrot.slane %v1406_v33, %v4769_v41  ;;  %v1413_v43 = vrot.slane %v1406_v33, %v4763_v38  ;;  %3656 = vmatprep.subr.bf16.mxu1 %v4544_v24 }
 0x341   :  { %v1421_v44 = vadd.f32 %v1417_v36, %v1408_v34  ;;  %v1420_v46 = vadd.f32 %v1413_v43, %v1407_v40  ;;  %v3916_v34 = vld [vmem:[#allocation22 + $0x38] sm:$0xff]   ;;  %v3917_v36 = vld [vmem:[#allocation22 + $0x30] sm:$0xff]   ;;  %v3918_v40 = vld [vmem:[#allocation22 + $0x28] sm:$0xff]  }
 0x342   :  { %3657 = vmatpush3.bf16.msra.mxu1 %v3912_v54  ;;  %v3919_v43 = vld [vmem:[#allocation22 + $0x20] sm:$0xff]  }
 0x343   :  { %vm1423_vm4 = vcmp.ge.f32.partialorder %v1421_v44, 0.0  ;;  %v1425_v47 = vmul.f32 0.01, %v1421_v44  ;;  %vm1422_vm5 = vcmp.ge.f32.partialorder %v1420_v46, 0.0  ;;  %v1424_v48 = vmul.f32 0.01, %v1420_v46  ;;  %3658 = vmatprep.subr.bf16.mxu1 %v4544_v24 }
 0x345   :  { %v1427_v51 = vsel %vm1423_vm4, %v1421_v44, %v1425_v47  ;;  %v1426_v52 = vsel %vm1422_vm5, %v1420_v46, %v1424_v48  ;;  %v3920_v44 = vld [vmem:[#allocation22 + $0x18] sm:$0xff]   ;;  %v3922_v46 = vld [vmem:[#allocation22 + $0x8] sm:$0xff]   ;;  %v3923_v47 = vld [vmem:[#allocation22] sm:$0xff]  }
 0x346   :  { %v1462_v19 = vpack.c.bf16 %v1427_v51, %v1427_v51  ;;  %v1461_v25 = vpack.c.bf16 %v1426_v52, %v1426_v52  ;;  %3659 = vmatpush3.bf16.msra.mxu1 %v3913_v57  ;;  %v3433_v48 = vld [vmem:[%s4970_s0] ss:$0 sm:$0xff] }
 0x347   :  { %3660 = vmatprep.subr.bf16.mxu1 %v4544_v24 }
 0x348   :  { %1597 = vmatprep.mubr.bf16.mxu0 %v1462_v19 }
 0x349   :  { %1598 = vmatmul.mubr.bf16.vlgmr.msra.gmra.mxu0 %v1461_v25 }
 0x34a   :  { %3684 = vmatprep.mubr.msk.bf16.mxu0 %vm4545_vm6, %v4544_v24  ;;  %3661 = vmatpush3.bf16.msra.mxu1 %v3914_v58 }
 0x34b   :  { %3662 = vmatprep.subr.bf16.mxu1 %v4544_v24  ;;  %3669 = vmatpush3.bf16.msra.mxu0 %v3916_v34  ;;  %v3945_v34 = vld [vmem:[#allocation23] ss:$8 sps:$4 sm:$0xff]  }
 0x34c   :  { %3670 = vmatprep.subr.bf16.mxu0 %v4544_v24 }
 0x34e   :  { %3663 = vmatpush3.bf16.msra.mxu1 %v3915_v59 }
 0x34f   :  { %3671 = vmatpush3.bf16.msra.mxu0 %v3917_v36  ;;  %v3442_v36 = vld [vmem:[%s4973_s15] ss:$0 sm:$0xff] }
 0x350   :  { %3672 = vmatprep.subr.bf16.mxu0 %v4544_v24 }
 0x353   :  { %3673 = vmatpush3.bf16.msra.mxu0 %v3918_v40 }
 0x354   :  { %3674 = vmatprep.subr.bf16.mxu0 %v4544_v24 }
 0x357   :  { %3675 = vmatpush3.bf16.msra.mxu0 %v3919_v43 }
 0x358   :  { %3676 = vmatprep.subr.bf16.mxu0 %v4544_v24 }
 0x35b   :  { %3677 = vmatpush3.bf16.msra.mxu0 %v3920_v44 }
 0x35c   :  { %3678 = vmatprep.subr.bf16.mxu0 %v4544_v24 }
 0x409   :  { %v3580_v60 = vpop.f32.mrf.mxu0 }
 0x40b   :  { %v3581_v56 = vpop.f32.mrf.mxu0 }
 0x40c   :  { %v3582_v55 = vadd.f32 %v3581_v56, %v3580_v60 }
 0x40d   :  { %v3583_v49 = vpop.f32.mrf.mxu0 }
 0x40e   :  { %v1600_v50 = vadd.f32 %v3582_v55, %v3416_v61 }
 0x40f   :  { %v3584_v62 = vpop.f32.mrf.mxu0 }
 0x410   :  { %v1607_v63 = vrot.slane %v1600_v50, 4 }
 0x412   :  { %v1608_v1 = vadd.f32 %v1607_v63, %v1600_v50 }
 0x414   :  { %v1609_v2 = vrot.slane %v1608_v1, 2 }
 0x416   :  { %v1610_v3 = vadd.f32 %v1609_v2, %v1608_v1  ;;  %v1757_v2 = vld [vmem:[%s4971_s7] sm:$0x1] }
 0x418   :  { %v1611_v4 = vrot.slane %v1610_v3, 1 }
 0x41a   :  { %v1612_v5 = vadd.f32 %v1611_v4, %v1610_v3 }
 0x41c   :  { %v1613_v6 = vmul.f32 0.125, %v1612_v5  ;;  %v1758_v5 = vld [vmem:[%s4972_s8] sm:$0x1] }
 0x41e   :  { %v1614_v7 = vsub.f32 %v1600_v50, %v1613_v6 }
 0x420   :  { %v1615_v8 = vmul.f32 %v1614_v7, %v1614_v7 }
 0x422   :  { %v1616_v9 = vrot.slane %v1615_v8, 4 }
 0x424   :  { %v1617_v10 = vadd.f32 %v1616_v9, %v1615_v8 }
 0x426   :  { %v1618_v11 = vrot.slane %v1617_v10, 2 }
 0x428   :  { %v1619_v12 = vadd.f32 %v1618_v11, %v1617_v10 }
 0x42a   :  { %v1620_v13 = vrot.slane %v1619_v12, 1 }
 0x42c   :  { %v1621_v14 = vadd.f32 %v1620_v13, %v1619_v12 }
 0x42e   :  { %v1622_v16 = vmul.f32 0.125, %v1621_v14 }
 0x430   :  { %v1623_v17 = vadd.f32 1e-05, %v1622_v16  ;;  %v3926_v16 = vld [vmem:[#allocation23 + $0x74] ss:$8 sps:$4 sm:$0xff]  }
 0x431   :  { %2059 = vmatprep.subr.bf16.mxu1 %v3926_v16  ;;  %v3957_v16 = vld [vmem:[#allocation25 + $0xc8] ss:$16 sps:$4 sm:$0xff]  }
 0x432   :  { %4088 = vrsqrt.f32 %v1623_v17  ;;  %v3924_v17 = vld [vmem:[#allocation23 + $0x70] ss:$8 sps:$4 sm:$0xff]  }
 0x43f   :  { %v4089_v21 = vpop.eup %4088 }
 0x440   :  { %v1625_v22 = vmul.f32 %v4089_v21, %v1605_v20  ;;  %v3929_v20 = vld [vmem:[#allocation23 + $0x64] ss:$8 sps:$4 sm:$0xff]   ;;  %v3927_v21 = vld [vmem:[#allocation23 + $0x60] ss:$8 sps:$4 sm:$0xff]  }
 0x442   :  { %v1626_v26 = vmul.f32 %v1625_v22, %v1613_v6  ;;  %v1632_v27 = vrot.slane %v1625_v22, %v4763_v38  ;;  %v3932_v22 = vld [vmem:[#allocation23 + $0x54] ss:$8 sps:$4 sm:$0xff]  }
 0x444   :  { %v1627_v28 = vsub.f32 %v1606_v23, %v1626_v26  ;;  %v1634_v29 = vmul.f32 %v1632_v27, %v1600_v50  ;;  %v3930_v23 = vld [vmem:[#allocation23 + $0x50] ss:$8 sps:$4 sm:$0xff]   ;;  %v3935_v26 = vld [vmem:[#allocation23 + $0x44] ss:$8 sps:$4 sm:$0xff]   ;;  %v3933_v27 = vld [vmem:[#allocation23 + $0x40] ss:$8 sps:$4 sm:$0xff]  }
 0x446   :  { %v1639_v30 = vrot.slane %v1627_v28, %v4763_v38  ;;  %v3938_v28 = vld [vmem:[#allocation23 + $0x34] ss:$8 sps:$4 sm:$0xff]  }
 0x448   :  { %v1641_v31 = vadd.f32 %v1639_v30, %v1634_v29  ;;  %v3936_v29 = vld [vmem:[#allocation23 + $0x30] ss:$8 sps:$4 sm:$0xff]   ;;  %v3941_v30 = vld [vmem:[#allocation23 + $0x24] ss:$8 sps:$4 sm:$0xff]  }
 0x44a   :  { %vm1642_vm7 = vcmp.ge.f32.partialorder %v1641_v31, 0.0  ;;  %v1643_v37 = vmul.f32 0.01, %v1641_v31 }
 0x44c   :  { %v1644_v32 = vsel %vm1642_vm7, %v1641_v31, %v1643_v37  ;;  %v3939_v31 = vld [vmem:[#allocation23 + $0x20] ss:$8 sps:$4 sm:$0xff]   ;;  %v3944_v37 = vld [vmem:[#allocation23 + $0x14] ss:$8 sps:$4 sm:$0xff]  }
 0x44d   :  { %v1662_v33 = vpack.c.bf16 %v1644_v32, %v1644_v32  ;;  %v3942_v32 = vld [vmem:[#allocation23 + $0x10] ss:$8 sps:$4 sm:$0xff]  }
 0x44f   :  { %3665 = vmatmul.mubr.bf16.vlgmr.msra.gmra.mxu1 %v1662_v33  ;;  %v3947_v33 = vld [vmem:[#allocation23 + $0x4] ss:$8 sps:$4 sm:$0xff]  }
 0x450   :  { %2091 = vmatprep.mubr.bf16.mxu1 %v4542_v0  ;;  %v3921_v0 = vld [vmem:[#allocation22 + $0x10] sm:$0xff]   ;;  %2060 = vmatpush1.bf16.msra.mxu1 %v3924_v17 }
 0x451   :  { %3679 = vmatpush3.bf16.msra.mxu0 %v3921_v0  ;;  %2061 = vmatprep.subr.bf16.mxu1 %v3929_v20  ;;  %v3962_v17 = vld [vmem:[#allocation25 + $0xa4] ss:$16 sps:$4 sm:$0xff]   ;;  %v3965_v20 = vld [vmem:[#allocation25 + $0xac] ss:$16 sps:$4 sm:$0xff]  }
 0x452   :  { %3680 = vmatprep.subr.bf16.mxu0 %v4544_v24 }
 0x454   :  { %2062 = vmatpush1.bf16.msra.mxu1 %v3927_v21  ;;  %v3960_v21 = vld [vmem:[#allocation25 + $0xa0] ss:$16 sps:$4 sm:$0xff]  }
 0x455   :  { %3681 = vmatpush3.bf16.msra.mxu0 %v3922_v46  ;;  %2063 = vmatprep.subr.bf16.mxu1 %v3932_v22  ;;  %v3963_v22 = vld [vmem:[#allocation25 + $0xa8] ss:$16 sps:$4 sm:$0xff]  }
 0x456   :  { %3682 = vmatprep.subr.bf16.mxu0 %v4544_v24 }
 0x458   :  { %2064 = vmatpush1.bf16.msra.mxu1 %v3930_v23  ;;  %v3968_v23 = vld [vmem:[#allocation25 + $0x84] ss:$16 sps:$4 sm:$0xff]  }
 0x459   :  { %3683 = vmatpush3.bf16.msra.mxu0 %v3923_v47  ;;  %2065 = vmatprep.subr.bf16.mxu1 %v3935_v26  ;;  %v3971_v26 = vld [vmem:[#allocation25 + $0x8c] ss:$16 sps:$4 sm:$0xff]  }
 0x45c   :  { %2066 = vmatpush1.bf16.msra.mxu1 %v3933_v27  ;;  %v3966_v27 = vld [vmem:[#allocation25 + $0x80] ss:$16 sps:$4 sm:$0xff]  }
 0x45d   :  { %2067 = vmatprep.subr.bf16.mxu1 %v3938_v28  ;;  %v3969_v28 = vld [vmem:[#allocation25 + $0x88] ss:$16 sps:$4 sm:$0xff]  }
 0x460   :  { %2068 = vmatpush1.bf16.msra.mxu1 %v3936_v29  ;;  %v3974_v29 = vld [vmem:[#allocation25 + $0x64] ss:$16 sps:$4 sm:$0xff]  }
 0x461   :  { %2069 = vmatprep.subr.bf16.mxu1 %v3941_v30  ;;  %v3977_v30 = vld [vmem:[#allocation25 + $0x6c] ss:$16 sps:$4 sm:$0xff]  }
 0x464   :  { %2070 = vmatpush1.bf16.msra.mxu1 %v3939_v31  ;;  %v3972_v31 = vld [vmem:[#allocation25 + $0x60] ss:$16 sps:$4 sm:$0xff]  }
 0x465   :  { %2071 = vmatprep.subr.bf16.mxu1 %v3944_v37  ;;  %v3975_v37 = vld [vmem:[#allocation25 + $0x68] ss:$16 sps:$4 sm:$0xff]  }
 0x468   :  { %2072 = vmatpush1.bf16.msra.mxu1 %v3942_v32  ;;  %v3980_v32 = vld [vmem:[#allocation25 + $0x44] ss:$16 sps:$4 sm:$0xff]  }
 0x469   :  { %2073 = vmatprep.subr.bf16.mxu1 %v3947_v33  ;;  %v3983_v33 = vld [vmem:[#allocation25 + $0x4c] ss:$16 sps:$4 sm:$0xff]  }
 0x46c   :  { %2074 = vmatpush1.bf16.msra.mxu1 %v3945_v34  ;;  %v3978_v34 = vld [vmem:[#allocation25 + $0x40] ss:$16 sps:$4 sm:$0xff]  }
 0x50f   :  { %v1751_v51 = vpop.f32.mrf.mxu1 }
 0x510   :  { %v1752_v52 = vadd.f32 %v3433_v48, %v1751_v51 }
 0x511   :  { %v3666_v19 = vpop.f32.mrf.mxu1 }
 0x512   :  { %v1759_v25 = vrot.slane %v1752_v52, 4 }
 0x513   :  { %v1754_v18 = vpop.f32.mrf.mxu1 }
 0x514   :  { %v1760_v35 = vadd.f32 %v1759_v25, %v1752_v52 }
 0x515   :  { %v3667_v45 = vpop.f32.mrf.mxu1 }
 0x516   :  { %v1761_v53 = vrot.slane %v1760_v35, 2 }
 0x518   :  { %v1762_v54 = vadd.f32 %v1761_v53, %v1760_v35 }
 0x51a   :  { %v1763_v57 = vrot.slane %v1762_v54, 1 }
 0x51c   :  { %v1764_v58 = vadd.f32 %v1763_v57, %v1762_v54 }
 0x51e   :  { %v1765_v59 = vmul.f32 0.125, %v1764_v58 }
 0x520   :  { %v1766_v60 = vsub.f32 %v1752_v52, %v1765_v59 }
 0x522   :  { %v1767_v61 = vmul.f32 %v1766_v60, %v1766_v60 }
 0x524   :  { %v1768_v56 = vrot.slane %v1767_v61, 4 }
 0x526   :  { %v1769_v24 = vadd.f32 %v1768_v56, %v1767_v61 }
 0x528   :  { %v1770_v55 = vrot.slane %v1769_v24, 2 }
 0x52a   :  { %v1771_v49 = vadd.f32 %v1770_v55, %v1769_v24  ;;  %v1910_v24 = vld [vmem:[%s4974_s29] sm:$0x1] }
 0x52c   :  { %v1772_v50 = vrot.slane %v1771_v49, 1 }
 0x52e   :  { %v1773_v62 = vadd.f32 %v1772_v50, %v1771_v49  ;;  %v1911_v50 = vld [vmem:[%s4975_s30] sm:$0x1] }
 0x530   :  { %v1774_v63 = vmul.f32 0.125, %v1773_v62 }
 0x532   :  { %v1775_v1 = vadd.f32 1e-05, %v1774_v63 }
 0x534   :  { %4090 = vrsqrt.f32 %v1775_v1 }
 0x541   :  { %v4091_v3 = vpop.eup %4090 }
 0x542   :  { %v1777_v4 = vmul.f32 %v4091_v3, %v1757_v2 }
 0x544   :  { %v1778_v6 = vmul.f32 %v1777_v4, %v1765_v59  ;;  %v1784_v7 = vrot.slane %v1777_v4, %v4763_v38 }
 0x546   :  { %v1779_v8 = vsub.f32 %v1758_v5, %v1778_v6  ;;  %v1786_v9 = vmul.f32 %v1784_v7, %v1752_v52 }
 0x548   :  { %v1791_v10 = vrot.slane %v1779_v8, %v4763_v38  ;;  %v3950_v8 = vld [vmem:[#allocation25 + $0xe4] ss:$16 sps:$4 sm:$0xff]  }
 0x549   :  { %2618 = vmatprep.subr.bf16.mxu0 %v3950_v8  ;;  %v4035_v8 = vld [vmem:[#allocation25 + $0x128] ss:$16 sps:$4 sm:$0xff]  }
 0x54a   :  { %v1793_v11 = vadd.f32 %v1791_v10, %v1786_v9  ;;  %v3953_v9 = vld [vmem:[#allocation25 + $0xec] ss:$16 sps:$4 sm:$0xff]   ;;  %v3948_v10 = vld [vmem:[#allocation25 + $0xe0] ss:$16 sps:$4 sm:$0xff]  }
 0x54b   :  { %2659 = vmatprep.subr.bf16.mxu1 %v3953_v9  ;;  %v4040_v9 = vld [vmem:[#allocation25 + $0x104] ss:$16 sps:$4 sm:$0xff]  }
 0x54c   :  { %vm1794_vm8 = vcmp.ge.f32.partialorder %v1793_v11, 0.0  ;;  %v1795_v12 = vmul.f32 0.01, %v1793_v11 }
 0x54e   :  { %v1796_v13 = vsel %vm1794_vm8, %v1793_v11, %v1795_v12  ;;  %v3951_v11 = vld [vmem:[#allocation25 + $0xe8] ss:$16 sps:$4 sm:$0xff]   ;;  %v3956_v12 = vld [vmem:[#allocation25 + $0xc4] ss:$16 sps:$4 sm:$0xff]  }
 0x54f   :  { %v1815_v14 = vpack.c.bf16 %v1796_v13, %v1796_v13  ;;  %1797 = vst [vmem:[#allocation28] sm:$0xff] %v1796_v13  ;;  %v3959_v13 = vld [vmem:[#allocation25 + $0xcc] ss:$16 sps:$4 sm:$0xff]  }
 0x551   :  { %3685 = vmatmul.mubr.bf16.vlgmr.msra.gmra.mxu0 %v1815_v14  ;;  %v3954_v14 = vld [vmem:[#allocation25 + $0xc0] ss:$16 sps:$4 sm:$0xff]  }
 0x552   :  { %2619 = vmatpush1.bf16.msra.mxu0 %v3948_v10  ;;  %v4043_v10 = vld [vmem:[#allocation25 + $0x10c] ss:$16 sps:$4 sm:$0xff]  }
 0x553   :  { %2620 = vmatprep.subr.bf16.mxu0 %v3956_v12  ;;  %v4041_v12 = vld [vmem:[#allocation25 + $0x108] ss:$16 sps:$4 sm:$0xff]  }
 0x556   :  { %2621 = vmatpush1.bf16.msra.mxu0 %v3954_v14 }
 0x557   :  { %2622 = vmatprep.subr.bf16.mxu0 %v3962_v17 }
 0x55a   :  { %2623 = vmatpush1.bf16.msra.mxu0 %v3960_v21 }
 0x55b   :  { %2624 = vmatprep.subr.bf16.mxu0 %v3968_v23 }
 0x55e   :  { %2625 = vmatpush1.bf16.msra.mxu0 %v3966_v27 }
 0x55f   :  { %2626 = vmatprep.subr.bf16.mxu0 %v3974_v29 }
 0x562   :  { %2627 = vmatpush1.bf16.msra.mxu0 %v3972_v31 }
 0x563   :  { %2628 = vmatprep.subr.bf16.mxu0 %v3980_v32 }
 0x566   :  { %2629 = vmatpush1.bf16.msra.mxu0 %v3978_v34 }
 0x611   :  { %v1904_v40 = vpop.f32.mrf.mxu0 }
 0x612   :  { %v1905_v43 = vadd.f32 %v3442_v36, %v1904_v40  ;;  %v3981_v36 = vld [vmem:[#allocation25 + $0x48] ss:$16 sps:$4 sm:$0xff]   ;;  %v3986_v40 = vld [vmem:[#allocation25 + $0x24] ss:$16 sps:$4 sm:$0xff]  }
 0x613   :  { %v3686_v44 = vpop.f32.mrf.mxu0  ;;  %2630 = vmatprep.subr.bf16.mxu0 %v3986_v40 }
 0x614   :  { %v1912_v0 = vrot.slane %v1905_v43, 4  ;;  %v3984_v44 = vld [vmem:[#allocation25 + $0x20] ss:$16 sps:$4 sm:$0xff]  }
 0x615   :  { %v1907_v46 = vpop.f32.mrf.mxu0  ;;  %2631 = vmatpush1.bf16.msra.mxu0 %v3984_v44 }
 0x616   :  { %v1913_v47 = vadd.f32 %v1912_v0, %v1905_v43  ;;  %v3987_v0 = vld [vmem:[#allocation25 + $0x28] ss:$16 sps:$4 sm:$0xff]   ;;  %v3992_v46 = vld [vmem:[#allocation25 + $0x4] ss:$16 sps:$4 sm:$0xff]  }
 0x617   :  { %v3687_v48 = vpop.f32.mrf.mxu0  ;;  %2632 = vmatprep.subr.bf16.mxu0 %v3992_v46 }
 0x618   :  { %v1914_v51 = vrot.slane %v1913_v47, 2  ;;  %v3990_v48 = vld [vmem:[#allocation25] ss:$16 sps:$4 sm:$0xff]  }
 0x619   :  { %2633 = vmatpush1.bf16.msra.mxu0 %v3990_v48 }
 0x61a   :  { %v1915_v52 = vadd.f32 %v1914_v51, %v1913_v47  ;;  %v3995_v47 = vld [vmem:[#allocation25 + $0xc] ss:$16 sps:$4 sm:$0xff]   ;;  %v3993_v51 = vld [vmem:[#allocation25 + $0x8] ss:$16 sps:$4 sm:$0xff]  }
 0x61c   :  { %v1916_v19 = vrot.slane %v1915_v52, 1 }
 0x61e   :  { %v1917_v25 = vadd.f32 %v1916_v19, %v1915_v52  ;;  %v3998_v52 = vld [vmem:[#allocation25 + $0x1e4] ss:$16 sps:$4 sm:$0xff]   ;;  %v4001_v19 = vld [vmem:[#allocation25 + $0x1ec] ss:$16 sps:$4 sm:$0xff]  }
 0x61f   :  { %2634 = vmatprep.subr.bf16.mxu0 %v3998_v52 }
 0x620   :  { %v1918_v18 = vmul.f32 0.125, %v1917_v25  ;;  %v3996_v25 = vld [vmem:[#allocation25 + $0x1e0] ss:$16 sps:$4 sm:$0xff]  }
 0x621   :  { %2635 = vmatpush2.bf16.msra.mxu0 %v3996_v25 }
 0x622   :  { %v1919_v35 = vsub.f32 %v1905_v43, %v1918_v18 }
 0x624   :  { %v1920_v45 = vmul.f32 %v1919_v35, %v1919_v35  ;;  %v4004_v35 = vld [vmem:[#allocation25 + $0x1c4] ss:$16 sps:$4 sm:$0xff]  }
 0x625   :  { %2636 = vmatprep.subr.bf16.mxu0 %v4004_v35 }
 0x626   :  { %v1921_v53 = vrot.slane %v1920_v45, 4 }
 0x628   :  { %v1922_v54 = vadd.f32 %v1921_v53, %v1920_v45  ;;  %v4007_v45 = vld [vmem:[#allocation25 + $0x1cc] ss:$16 sps:$4 sm:$0xff]   ;;  %v4002_v53 = vld [vmem:[#allocation25 + $0x1c0] ss:$16 sps:$4 sm:$0xff]  }
 0x629   :  { %2637 = vmatpush2.bf16.msra.mxu0 %v4002_v53 }
 0x62a   :  { %v1923_v57 = vrot.slane %v1922_v54, 2 }
 0x62c   :  { %v1924_v58 = vadd.f32 %v1923_v57, %v1922_v54  ;;  %v4005_v54 = vld [vmem:[#allocation25 + $0x1c8] ss:$16 sps:$4 sm:$0xff]   ;;  %v4010_v57 = vld [vmem:[#allocation25 + $0x1a4] ss:$16 sps:$4 sm:$0xff]  }
 0x62d   :  { %2638 = vmatprep.subr.bf16.mxu0 %v4010_v57 }
 0x62e   :  { %v1925_v59 = vrot.slane %v1924_v58, 1 }
 0x630   :  { %v1926_v60 = vadd.f32 %v1925_v59, %v1924_v58  ;;  %v4013_v58 = vld [vmem:[#allocation25 + $0x1ac] ss:$16 sps:$4 sm:$0xff]   ;;  %v4008_v59 = vld [vmem:[#allocation25 + $0x1a0] ss:$16 sps:$4 sm:$0xff]  }
 0x631   :  { %2639 = vmatpush2.bf16.msra.mxu0 %v4008_v59 }
 0x632   :  { %v1927_v61 = vmul.f32 0.125, %v1926_v60  ;;  %v4011_v60 = vld [vmem:[#allocation25 + $0x1a8] ss:$16 sps:$4 sm:$0xff]  }
 0x634   :  { %v1928_v56 = vadd.f32 1e-05, %v1927_v61  ;;  %v4016_v61 = vld [vmem:[#allocation25 + $0x184] ss:$16 sps:$4 sm:$0xff]  }
 0x635   :  { %2640 = vmatprep.subr.bf16.mxu0 %v4016_v61 }
 0x636   :  { %4092 = vrsqrt.f32 %v1928_v56  ;;  %v4019_v56 = vld [vmem:[#allocation25 + $0x18c] ss:$16 sps:$4 sm:$0xff]  }
 0x643   :  { %v4093_v55 = vpop.eup %4092 }
 0x644   :  { %v1930_v49 = vmul.f32 %v4093_v55, %v1910_v24  ;;  %v4014_v24 = vld [vmem:[#allocation25 + $0x180] ss:$16 sps:$4 sm:$0xff]   ;;  %v4017_v55 = vld [vmem:[#allocation25 + $0x188] ss:$16 sps:$4 sm:$0xff]  }
 0x645   :  { %2641 = vmatpush2.bf16.msra.mxu0 %v4014_v24 }
 0x646   :  { %v1931_v62 = vmul.f32 %v1930_v49, %v1918_v18  ;;  %v1937_v63 = vrot.slane %v1930_v49, %v4763_v38  ;;  %v3999_v18 = vld [vmem:[#allocation25 + $0x1e8] ss:$16 sps:$4 sm:$0xff]   ;;  %v4022_v49 = vld [vmem:[#allocation25 + $0x164] ss:$16 sps:$4 sm:$0xff]  }
 0x647   :  { %2642 = vmatprep.subr.bf16.mxu0 %v4022_v49 }
 0x648   :  { %v1932_v1 = vsub.f32 %v1911_v50, %v1931_v62  ;;  %v1939_v2 = vmul.f32 %v1937_v63, %v1905_v43  ;;  %v3989_v43 = vld [vmem:[#allocation25 + $0x2c] ss:$16 sps:$4 sm:$0xff]   ;;  %v4020_v62 = vld [vmem:[#allocation25 + $0x160] ss:$16 sps:$4 sm:$0xff]   ;;  %v4023_v63 = vld [vmem:[#allocation25 + $0x168] ss:$16 sps:$4 sm:$0xff]  }
 0x649   :  { %v4025_v50 = vld [vmem:[#allocation25 + $0x16c] ss:$16 sps:$4 sm:$0xff]   ;;  %2643 = vmatpush2.bf16.msra.mxu0 %v4020_v62 }
 0x64a   :  { %v1944_v3 = vrot.slane %v1932_v1, %v4763_v38  ;;  %v4028_v1 = vld [vmem:[#allocation25 + $0x144] ss:$16 sps:$4 sm:$0xff]  }
 0x64b   :  { %2644 = vmatprep.subr.bf16.mxu0 %v4028_v1  ;;  %v2100_v1 = vld [vmem:[%s4977_s10] sm:$0x3] }
 0x64c   :  { %v1946_v4 = vadd.f32 %v1944_v3, %v1939_v2  ;;  %v4031_v2 = vld [vmem:[#allocation25 + $0x14c] ss:$16 sps:$4 sm:$0xff]   ;;  %v4026_v3 = vld [vmem:[#allocation25 + $0x140] ss:$16 sps:$4 sm:$0xff]  }
 0x64d   :  { %2645 = vmatpush2.bf16.msra.mxu0 %v4026_v3 }
 0x64e   :  { %vm1947_vm9 = vcmp.ge.f32.partialorder %v1946_v4, 0.0  ;;  %v1948_v5 = vmul.f32 0.01, %v1946_v4 }
 0x650   :  { %v1949_v6 = vsel %vm1947_vm9, %v1946_v4, %v1948_v5  ;;  %v4029_v4 = vld [vmem:[#allocation25 + $0x148] ss:$16 sps:$4 sm:$0xff]   ;;  %v4034_v5 = vld [vmem:[#allocation25 + $0x124] ss:$16 sps:$4 sm:$0xff]  }
 0x651   :  { %v1967_v7 = vpack.c.bf16 %v1949_v6, %v1949_v6  ;;  %v4037_v6 = vld [vmem:[#allocation25 + $0x12c] ss:$16 sps:$4 sm:$0xff]   ;;  %2646 = vmatprep.subr.bf16.mxu0 %v4034_v5 }
 0x653   :  { %2092 = vmatmul.mubr.bf16.vlgmr.msra.gmra.mxu1 %v1967_v7  ;;  %v4032_v7 = vld [vmem:[#allocation25 + $0x120] ss:$16 sps:$4 sm:$0xff]  }
 0x654   :  { %2660 = vmatpush1.bf16.msra.mxu1 %v3951_v11  ;;  %2647 = vmatpush2.bf16.msra.mxu0 %v4032_v7  ;;  %v4038_v11 = vld [vmem:[#allocation25 + $0x100] ss:$16 sps:$4 sm:$0xff]  }
 0x655   :  { %2661 = vmatprep.subr.bf16.mxu1 %v3959_v13  ;;  %2648 = vmatprep.subr.bf16.mxu0 %v4040_v9  ;;  %v1966_v13 = vld [vmem:[%s4976_s5] sm:$0x3] }
 0x656   :  { %v1972_v14 = vrot.slane %v1966_v13, %v4763_v38 }
 0x658   :  { %2662 = vmatpush1.bf16.msra.mxu1 %v3957_v16  ;;  %2649 = vmatpush2.bf16.msra.mxu0 %v4038_v11  ;;  %v1976_v16 = vrot.slane %v1966_v13, %v4769_v41 }
 0x659   :  { %2663 = vmatprep.subr.bf16.mxu1 %v3965_v20 }
 0x65c   :  { %2664 = vmatpush1.bf16.msra.mxu1 %v3963_v22 }
 0x65d   :  { %2665 = vmatprep.subr.bf16.mxu1 %v3971_v26 }
 0x660   :  { %2666 = vmatpush1.bf16.msra.mxu1 %v3969_v28 }
 0x661   :  { %2667 = vmatprep.subr.bf16.mxu1 %v3977_v30 }
 0x664   :  { %2668 = vmatpush1.bf16.msra.mxu1 %v3975_v37 }
 0x665   :  { %2669 = vmatprep.subr.bf16.mxu1 %v3983_v33 }
 0x668   :  { %2670 = vmatpush1.bf16.msra.mxu1 %v3981_v36 }
 0x669   :  { %2671 = vmatprep.subr.bf16.mxu1 %v3989_v43 }
 0x66c   :  { %2672 = vmatpush1.bf16.msra.mxu1 %v3987_v0 }
 0x66d   :  { %2673 = vmatprep.subr.bf16.mxu1 %v3995_v47 }
 0x670   :  { %2674 = vmatpush1.bf16.msra.mxu1 %v3993_v51 }
 0x671   :  { %2675 = vmatprep.subr.bf16.mxu1 %v4001_v19 }
 0x674   :  { %2676 = vmatpush2.bf16.msra.mxu1 %v3999_v18 }
 0x675   :  { %2677 = vmatprep.subr.bf16.mxu1 %v4007_v45 }
 0x678   :  { %2678 = vmatpush2.bf16.msra.mxu1 %v4005_v54 }
 0x679   :  { %2679 = vmatprep.subr.bf16.mxu1 %v4013_v58 }
 0x67c   :  { %2680 = vmatpush2.bf16.msra.mxu1 %v4011_v60 }
 0x67d   :  { %2681 = vmatprep.subr.bf16.mxu1 %v4019_v56 }
 0x680   :  { %2682 = vmatpush2.bf16.msra.mxu1 %v4017_v55 }
 0x681   :  { %2683 = vmatprep.subr.bf16.mxu1 %v4025_v50 }
 0x684   :  { %2684 = vmatpush2.bf16.msra.mxu1 %v4023_v63 }
 0x685   :  { %2685 = vmatprep.subr.bf16.mxu1 %v4031_v2 }
 0x688   :  { %2686 = vmatpush2.bf16.msra.mxu1 %v4029_v4 }
 0x689   :  { %2687 = vmatprep.subr.bf16.mxu1 %v4037_v6 }
 0x68c   :  { %2688 = vmatpush2.bf16.msra.mxu1 %v4035_v8 }
 0x68d   :  { %2689 = vmatprep.subr.bf16.mxu1 %v4043_v10  ;;  %v2101_v10 = vld [vmem:[%s4978_s11] sm:$0x3] }
 0x690   :  { %2690 = vmatpush2.bf16.msra.mxu1 %v4041_v12 }
 0x713   :  { %v2093_v17 = vpop.f32.mrf.mxu1 }
 0x714   :  { %v2094_v20 = vadd.f32 %v2093_v17, %v1972_v14 }
 0x715   :  { %v2095_v21 = vpop.f32.mrf.mxu1 }
 0x716   :  { %v2102_v22 = vrot.slane %v2094_v20, 4  ;;  %v2096_v23 = vadd.f32 %v2095_v21, %v1976_v16 }
 0x717   :  { %v2097_v26 = vpop.f32.mrf.mxu1 }
 0x718   :  { %v2103_v27 = vadd.f32 %v2102_v22, %v2094_v20  ;;  %v2108_v28 = vrot.slane %v2096_v23, 4 }
 0x719   :  { %v2098_v29 = vpop.f32.mrf.mxu1 }
 0x71a   :  { %v2104_v30 = vrot.slane %v2103_v27, 2  ;;  %v2109_v31 = vadd.f32 %v2108_v28, %v2096_v23 }
 0x71c   :  { %v2105_v37 = vadd.f32 %v2104_v30, %v2103_v27  ;;  %v2110_v32 = vrot.slane %v2109_v31, 2 }
 0x71e   :  { %v2106_v33 = vrot.slane %v2105_v37, 1  ;;  %v2111_v34 = vadd.f32 %v2110_v32, %v2109_v31  ;;  %v4046_v32 = vld [vmem:[#allocation26 + $0x38] sm:$0xff]  }
 0x720   :  { %v2107_v36 = vadd.f32 %v2106_v33, %v2105_v37  ;;  %v2112_v40 = vrot.slane %v2111_v34, 1  ;;  %v4045_v37 = vld [vmem:[#allocation26 + $0xf8] sm:$0xff]   ;;  %v4048_v33 = vld [vmem:[#allocation26 + $0x70] sm:$0xff]  }
 0x721   :  { %3626 = vmatprep.subr.bf16.mxu1 %v4045_v37 }
 0x722   :  { %v2114_v43 = vmul.f32 0.125, %v2107_v36  ;;  %v2113_v44 = vadd.f32 %v2112_v40, %v2111_v34  ;;  %v4049_v34 = vld [vmem:[#allocation26 + $0xf0] sm:$0xff]  }
 0x723   :  { %v4050_v36 = vld [vmem:[#allocation26 + $0x30] sm:$0xff]  }
 0x724   :  { %v2116_v0 = vsub.f32 %v2094_v20, %v2114_v43  ;;  %v2115_v46 = vmul.f32 0.125, %v2113_v44  ;;  %v4051_v40 = vld [vmem:[#allocation26 + $0xb0] sm:$0xff]   ;;  %v4053_v44 = vld [vmem:[#allocation26 + $0xe8] sm:$0xff]  }
 0x726   :  { %v2118_v47 = vmul.f32 %v2116_v0, %v2116_v0  ;;  %v2117_v48 = vsub.f32 %v2096_v23, %v2115_v46  ;;  %v4054_v0 = vld [vmem:[#allocation26 + $0x28] sm:$0xff]  }
 0x728   :  { %v2120_v51 = vrot.slane %v2118_v47, 4  ;;  %v2119_v52 = vmul.f32 %v2117_v48, %v2117_v48  ;;  %v4057_v48 = vld [vmem:[#allocation26 + $0xe0] sm:$0xff]  }
 0x72a   :  { %v2121_v19 = vadd.f32 %v2120_v51, %v2118_v47  ;;  %v2126_v25 = vrot.slane %v2119_v52, 4  ;;  %v4056_v47 = vld [vmem:[#allocation26 + $0x60] sm:$0xff]  }
 0x72b   :  { %v4058_v51 = vld [vmem:[#allocation26 + $0x20] sm:$0xff]  }
 0x72c   :  { %v2122_v18 = vrot.slane %v2121_v19, 2  ;;  %v2127_v35 = vadd.f32 %v2126_v25, %v2119_v52  ;;  %v4059_v52 = vld [vmem:[#allocation26 + $0xa0] sm:$0xff]   ;;  %v4061_v25 = vld [vmem:[#allocation26 + $0xd8] sm:$0xff]  }
 0x72e   :  { %v2123_v45 = vadd.f32 %v2122_v18, %v2121_v19  ;;  %v2128_v53 = vrot.slane %v2127_v35, 2  ;;  %v4060_v19 = vld [vmem:[#allocation26 + $0x58] sm:$0xff]  }
 0x72f   :  { %v4062_v18 = vld [vmem:[#allocation26 + $0x18] sm:$0xff]  }
 0x730   :  { %v2124_v54 = vrot.slane %v2123_v45, 1  ;;  %v2129_v57 = vadd.f32 %v2128_v53, %v2127_v35  ;;  %v4063_v35 = vld [vmem:[#allocation26 + $0x98] sm:$0xff]   ;;  %v4065_v53 = vld [vmem:[#allocation26 + $0xd0] sm:$0xff]  }
 0x732   :  { %v2125_v58 = vadd.f32 %v2124_v54, %v2123_v45  ;;  %v2130_v59 = vrot.slane %v2129_v57, 1  ;;  %v4064_v45 = vld [vmem:[#allocation26 + $0x50] sm:$0xff]  }
 0x733   :  { %v4066_v54 = vld [vmem:[#allocation26 + $0x10] sm:$0xff]  }
 0x734   :  { %v2132_v60 = vmul.f32 0.125, %v2125_v58  ;;  %v2131_v61 = vadd.f32 %v2130_v59, %v2129_v57  ;;  %v4067_v57 = vld [vmem:[#allocation26 + $0x90] sm:$0xff]   ;;  %v4068_v58 = vld [vmem:[#allocation26 + $0x48] sm:$0xff]  }
 0x735   :  { %v4069_v59 = vld [vmem:[#allocation26 + $0xc8] sm:$0xff]  }
 0x736   :  { %v2134_v56 = vadd.f32 1e-05, %v2132_v60  ;;  %v2133_v24 = vmul.f32 0.125, %v2131_v61  ;;  %v4070_v60 = vld [vmem:[#allocation26 + $0x8] sm:$0xff]  }
 0x737   :  { %v4071_v61 = vld [vmem:[#allocation26 + $0x88] sm:$0xff]  }
 0x738   :  { %v2135_v55 = vadd.f32 1e-05, %v2133_v24  ;;  %4094 = vrsqrt.f32 %v2134_v56  ;;  %v4072_v56 = vld [vmem:[#allocation26 + $0x40] sm:$0xff]  }
 0x739   :  { %v4073_v24 = vld [vmem:[#allocation26 + $0xc0] sm:$0xff]  }
 0x73a   :  { %4096 = vrsqrt.f32 %v2135_v55  ;;  %v4074_v55 = vld [vmem:[#allocation26] sm:$0xff]  }
 0x745   :  { %v4095_v49 = vpop.eup %4094 }
 0x747   :  { %v4097_v50 = vpop.eup %4096 }
 0x748   :  { %v2140_v62 = vcombine.low %v4095_v49, %v4097_v50  ;;  %v4075_v49 = vld [vmem:[#allocation26 + $0x80] sm:$0xff]  }
 0x749   :  { %v2274_v50 = vld [vmem:[%s4979_s16] sm:$0xf] }
 0x74a   :  { %v2147_v63 = vrot.slane %v2140_v62, %v4811_v15  ;;  %v2281_v62 = vrot.slane %v2274_v50, %v4763_v38 }
 0x74c   :  { %v2154_v2 = vrot.slane %v2147_v63, %v4811_v15  ;;  %v2289_v63 = vrot.slane %v2274_v50, %v4766_v39 }
 0x74e   :  { %v2156_v3 = vmul.f32 %v2154_v2, %v2100_v1  ;;  %v2285_v1 = vrot.slane %v2274_v50, %v4769_v41  ;;  %v2293_v2 = vrot.slane %v2274_v50, %v4772_v42 }
 0x750   :  { %v2161_v4 = vrot.slane %v2156_v3, %v4763_v38  ;;  %v2165_v5 = vrot.slane %v2156_v3, %v4769_v41 }
 0x752   :  { %v2168_v6 = vmul.f32 %v2161_v4, %v2114_v43  ;;  %v2169_v7 = vmul.f32 %v2165_v5, %v2115_v46  ;;  %v2190_v13 = vmul.f32 %v2165_v5, %v2096_v23  ;;  %v2189_v16 = vmul.f32 %v2161_v4, %v2094_v20  ;;  %v4044_v23 = vld [vmem:[#allocation26 + $0x78] sm:$0xff]   ;;  %v4052_v43 = vld [vmem:[#allocation26 + $0x68] sm:$0xff]  }
 0x753   :  { %v4047_v20 = vld [vmem:[#allocation26 + $0xb8] sm:$0xff]   ;;  %3604 = vmatprep.subr.bf16.mxu0 %v4044_v23  ;;  %v4055_v46 = vld [vmem:[#allocation26 + $0xa8] sm:$0xff]  }
 0x754   :  { %v2172_v8 = vcombine.low %v2168_v6, %v2169_v7 }
 0x756   :  { %v2179_v9 = vrot.slane %v2172_v8, %v4811_v15 }
 0x758   :  { %v2186_v11 = vrot.slane %v2179_v9, %v4811_v15 }
 0x75a   :  { %v2188_v12 = vsub.f32 %v2101_v10, %v2186_v11 }
 0x75c   :  { %v2199_v14 = vrot.slane %v2188_v12, %v4769_v41  ;;  %v2195_v17 = vrot.slane %v2188_v12, %v4763_v38 }
 0x75e   :  { %v2203_v21 = vadd.f32 %v2199_v14, %v2190_v13  ;;  %v2202_v22 = vadd.f32 %v2195_v17, %v2189_v16 }
 0x760   :  { %vm2205_vm10 = vcmp.ge.f32.partialorder %v2203_v21, 0.0  ;;  %v2207_v26 = vmul.f32 0.01, %v2203_v21  ;;  %vm2204_vm11 = vcmp.ge.f32.partialorder %v2202_v22, 0.0  ;;  %v2206_v27 = vmul.f32 0.01, %v2202_v22 }
 0x762   :  { %v2209_v28 = vsel %vm2205_vm10, %v2203_v21, %v2207_v26  ;;  %v2208_v29 = vsel %vm2204_vm11, %v2202_v22, %v2206_v27 }
 0x763   :  { %v2276_v30 = vpack.c.bf16 %v2209_v28, %v2209_v28  ;;  %v2275_v31 = vpack.c.bf16 %v2208_v29, %v2208_v29 }
 0x765   :  { %2650 = vmatprep.mubr.bf16.mxu0 %v2276_v30  ;;  %2691 = vmatprep.mubr.bf16.mxu1 %v2276_v30 }
 0x766   :  { %2651 = vmatmul.mubr.bf16.vlgmr.msra.gmra.mxu0 %v2275_v31  ;;  %2692 = vmatmul.mubr.bf16.vlgmr.msra.gmra.mxu1 %v2275_v31 }
 0x767   :  { %3605 = vmatpush3.bf16.msra.mxu0 %v4046_v32  ;;  %3627 = vmatpush3.bf16.msra.mxu1 %v4047_v20 }
 0x768   :  { %3606 = vmatprep.subr.bf16.mxu0 %v4048_v33  ;;  %3628 = vmatprep.subr.bf16.mxu1 %v4049_v34 }
 0x76b   :  { %3607 = vmatpush3.bf16.msra.mxu0 %v4050_v36  ;;  %3629 = vmatpush3.bf16.msra.mxu1 %v4051_v40 }
 0x76c   :  { %3608 = vmatprep.subr.bf16.mxu0 %v4052_v43  ;;  %3630 = vmatprep.subr.bf16.mxu1 %v4053_v44 }
 0x76f   :  { %3609 = vmatpush3.bf16.msra.mxu0 %v4054_v0  ;;  %3631 = vmatpush3.bf16.msra.mxu1 %v4055_v46 }
 0x770   :  { %3610 = vmatprep.subr.bf16.mxu0 %v4056_v47  ;;  %3632 = vmatprep.subr.bf16.mxu1 %v4057_v48 }
 0x773   :  { %3611 = vmatpush3.bf16.msra.mxu0 %v4058_v51  ;;  %3633 = vmatpush3.bf16.msra.mxu1 %v4059_v52 }
 0x774   :  { %3612 = vmatprep.subr.bf16.mxu0 %v4060_v19  ;;  %3634 = vmatprep.subr.bf16.mxu1 %v4061_v25 }
 0x777   :  { %3613 = vmatpush3.bf16.msra.mxu0 %v4062_v18  ;;  %3635 = vmatpush3.bf16.msra.mxu1 %v4063_v35 }
 0x778   :  { %3614 = vmatprep.subr.bf16.mxu0 %v4064_v45  ;;  %3636 = vmatprep.subr.bf16.mxu1 %v4065_v53 }
 0x77b   :  { %3615 = vmatpush3.bf16.msra.mxu0 %v4066_v54  ;;  %3637 = vmatpush3.bf16.msra.mxu1 %v4067_v57 }
 0x77c   :  { %3616 = vmatprep.subr.bf16.mxu0 %v4068_v58  ;;  %3638 = vmatprep.subr.bf16.mxu1 %v4069_v59 }
 0x77f   :  { %3617 = vmatpush3.bf16.msra.mxu0 %v4070_v60  ;;  %3639 = vmatpush3.bf16.msra.mxu1 %v4071_v61 }
 0x780   :  { %3618 = vmatprep.subr.bf16.mxu0 %v4072_v56  ;;  %3640 = vmatprep.subr.bf16.mxu1 %v4073_v24 }
 0x783   :  { %3619 = vmatpush3.bf16.msra.mxu0 %v4074_v55  ;;  %3641 = vmatpush3.bf16.msra.mxu1 %v4075_v49 }
 0x826   :  { %v2652_v3 = vpop.f32.mrf.mxu0  ;;  %v2693_v4 = vpop.f32.mrf.mxu1 }
 0x827   :  { %v4896_v5 = vadd.f32 %v2652_v3, %v2281_v62  ;;  %v4898_v6 = vadd.f32 %v2693_v4, %v2289_v63 }
 0x828   :  { %v2654_v7 = vpop.f32.mrf.mxu0  ;;  %v2695_v8 = vpop.f32.mrf.mxu1 }
 0x829   :  { %v2702_v9 = vrot.slane %v4896_v5, 4  ;;  %v2714_v10 = vrot.slane %v4898_v6, 4  ;;  %v4902_v11 = vadd.f32 %v2654_v7, %v2285_v1  ;;  %v4904_v12 = vadd.f32 %v2695_v8, %v2293_v2 }
 0x82a   :  { %v2656_v13 = vpop.f32.mrf.mxu0  ;;  %v2697_v14 = vpop.f32.mrf.mxu1 }
 0x82b   :  { %v2703_v16 = vadd.f32 %v2702_v9, %v4896_v5  ;;  %v2715_v17 = vadd.f32 %v2714_v10, %v4898_v6  ;;  %v2708_v21 = vrot.slane %v4902_v11, 4  ;;  %v2720_v22 = vrot.slane %v4904_v12, 4 }
 0x82c   :  { %v2657_v26 = vpop.f32.mrf.mxu0  ;;  %v2698_v27 = vpop.f32.mrf.mxu1 }
 0x82d   :  { %v2704_v28 = vrot.slane %v2703_v16, 2  ;;  %v2716_v29 = vrot.slane %v2715_v17, 2  ;;  %v2709_v30 = vadd.f32 %v2708_v21, %v4902_v11  ;;  %v2721_v31 = vadd.f32 %v2720_v22, %v4904_v12 }
 0x82f   :  { %v2705_v23 = vadd.f32 %v2704_v28, %v2703_v16  ;;  %v2717_v37 = vadd.f32 %v2716_v29, %v2715_v17  ;;  %v2710_v32 = vrot.slane %v2709_v30, 2  ;;  %v2722_v20 = vrot.slane %v2721_v31, 2 }
 0x831   :  { %v2706_v33 = vrot.slane %v2705_v23, 1  ;;  %v2718_v34 = vrot.slane %v2717_v37, 1  ;;  %v2711_v36 = vadd.f32 %v2710_v32, %v2709_v30  ;;  %v2723_v40 = vadd.f32 %v2722_v20, %v2721_v31 }
 0x833   :  { %v2707_v43 = vadd.f32 %v2706_v33, %v2705_v23  ;;  %v2719_v44 = vadd.f32 %v2718_v34, %v2717_v37  ;;  %v2712_v0 = vrot.slane %v2711_v36, 1  ;;  %v2724_v46 = vrot.slane %v2723_v40, 1 }
 0x835   :  { %v4912_v47 = vmul.f32 0.125, %v2707_v43  ;;  %v4914_v48 = vmul.f32 0.125, %v2719_v44  ;;  %v2713_v51 = vadd.f32 %v2712_v0, %v2711_v36  ;;  %v2725_v52 = vadd.f32 %v2724_v46, %v2723_v40 }
 0x837   :  { %v2730_v19 = vsub.f32 %v4896_v5, %v4912_v47  ;;  %v2732_v25 = vsub.f32 %v4898_v6, %v4914_v48  ;;  %v4920_v18 = vmul.f32 0.125, %v2713_v51  ;;  %v2729_v35 = vmul.f32 0.125, %v2725_v52  ;;  %v2700_v51 = vld [vmem:[%s4980_s18] sm:$0xf] }
 0x839   :  { %v2734_v45 = vmul.f32 %v2730_v19, %v2730_v19  ;;  %v2736_v53 = vmul.f32 %v2732_v25, %v2732_v25  ;;  %v2731_v54 = vsub.f32 %v4902_v11, %v4920_v18  ;;  %v2733_v57 = vsub.f32 %v4904_v12, %v2729_v35 }
 0x83b   :  { %v2738_v58 = vrot.slane %v2734_v45, 4  ;;  %v2750_v59 = vrot.slane %v2736_v53, 4  ;;  %v2735_v60 = vmul.f32 %v2731_v54, %v2731_v54  ;;  %v2737_v61 = vmul.f32 %v2733_v57, %v2733_v57 }
 0x83d   :  { %v2739_v56 = vadd.f32 %v2738_v58, %v2734_v45  ;;  %v2751_v24 = vadd.f32 %v2750_v59, %v2736_v53  ;;  %v2744_v55 = vrot.slane %v2735_v60, 4  ;;  %v2756_v49 = vrot.slane %v2737_v61, 4 }
 0x83f   :  { %v2740_v50 = vrot.slane %v2739_v56, 2  ;;  %v2752_v62 = vrot.slane %v2751_v24, 2  ;;  %v2745_v63 = vadd.f32 %v2744_v55, %v2735_v60  ;;  %v2757_v1 = vadd.f32 %v2756_v49, %v2737_v61 }
 0x841   :  { %v2741_v2 = vadd.f32 %v2740_v50, %v2739_v56  ;;  %v2753_v3 = vadd.f32 %v2752_v62, %v2751_v24  ;;  %v2746_v4 = vrot.slane %v2745_v63, 2  ;;  %v2758_v7 = vrot.slane %v2757_v1, 2  ;;  %v2701_v50 = vld [vmem:[%s4981_s13] sm:$0xf] }
 0x843   :  { %v2742_v8 = vrot.slane %v2741_v2, 1  ;;  %v2754_v9 = vrot.slane %v2753_v3, 1  ;;  %v2747_v10 = vadd.f32 %v2746_v4, %v2745_v63  ;;  %v2759_v13 = vadd.f32 %v2758_v7, %v2757_v1 }
 0x845   :  { %v2743_v14 = vadd.f32 %v2742_v8, %v2741_v2  ;;  %v2755_v16 = vadd.f32 %v2754_v9, %v2753_v3  ;;  %v2748_v17 = vrot.slane %v2747_v10, 1  ;;  %v2760_v21 = vrot.slane %v2759_v13, 1 }
 0x847   :  { %v2762_v22 = vmul.f32 0.125, %v2743_v14  ;;  %v2764_v26 = vmul.f32 0.125, %v2755_v16  ;;  %v2749_v27 = vadd.f32 %v2748_v17, %v2747_v10  ;;  %v2761_v28 = vadd.f32 %v2760_v21, %v2759_v13 }
 0x849   :  { %v2766_v29 = vadd.f32 1e-05, %v2762_v22  ;;  %v2768_v30 = vadd.f32 1e-05, %v2764_v26  ;;  %v2763_v31 = vmul.f32 0.125, %v2749_v27  ;;  %v2765_v23 = vmul.f32 0.125, %v2761_v28 }
 0x84b   :  { %4098 = vrsqrt.f32 %v2766_v29  ;;  %v2767_v37 = vadd.f32 1e-05, %v2763_v31  ;;  %v2769_v32 = vadd.f32 1e-05, %v2765_v23 }
 0x84c   :  { %4100 = vrsqrt.f32 %v2768_v30 }
 0x84d   :  { %4102 = vrsqrt.f32 %v2767_v37 }
 0x84e   :  { %4104 = vrsqrt.f32 %v2769_v32 }
 0x858   :  { %v4099_v20 = vpop.eup %4098 }
 0x859   :  { %v4101_v33 = vpop.eup %4100 }
 0x85a   :  { %v4103_v34 = vpop.eup %4102 }
 0x85b   :  { %v4105_v36 = vpop.eup %4104  ;;  %v2778_v40 = vcombine.low %v4099_v20, %v4103_v34 }
 0x85c   :  { %v2779_v43 = vcombine.low %v4101_v33, %v4105_v36 }
 0x85d   :  { %v2786_v44 = vrot.slane %v2778_v40, %v4811_v15 }
 0x85e   :  { %v2793_v0 = vrot.slane %v2779_v43, %v4811_v15 }
 0x860   :  { %v2794_v46 = vcombine.low %v2786_v44, %v2793_v0 }
 0x862   :  { %v2801_v52 = vrot.slane %v2794_v46, %v4811_v15 }
 0x864   :  { %v2803_v19 = vmul.f32 %v2801_v52, %v2700_v51 }
 0x866   :  { %v2816_v25 = vrot.slane %v2803_v19, %v4766_v39  ;;  %v2820_v45 = vrot.slane %v2803_v19, %v4772_v42  ;;  %v2808_v53 = vrot.slane %v2803_v19, %v4763_v38  ;;  %v2812_v54 = vrot.slane %v2803_v19, %v4769_v41 }
 0x868   :  { %v2827_v57 = vmul.f32 %v2816_v25, %v4914_v48  ;;  %v2828_v58 = vmul.f32 %v2820_v45, %v2729_v35  ;;  %v2825_v59 = vmul.f32 %v2808_v53, %v4912_v47  ;;  %v2826_v60 = vmul.f32 %v2812_v54, %v4920_v18 }
 0x869   :  { %v2862_v1 = vmul.f32 %v2820_v45, %v4904_v12  ;;  %v2860_v48 = vmul.f32 %v2812_v54, %v4902_v11  ;;  %v2859_v35 = vmul.f32 %v2808_v53, %v4896_v5  ;;  %v2861_v47 = vmul.f32 %v2816_v25, %v4898_v6 }
 0x86a   :  { %v2834_v61 = vcombine.low %v2827_v57, %v2828_v58  ;;  %v2833_v56 = vcombine.low %v2825_v59, %v2826_v60 }
 0x86c   :  { %v2848_v24 = vrot.slane %v2834_v61, %v4811_v15  ;;  %v2841_v55 = vrot.slane %v2833_v56, %v4811_v15 }
 0x86e   :  { %v2849_v49 = vcombine.low %v2841_v55, %v2848_v24 }
 0x870   :  { %v2856_v62 = vrot.slane %v2849_v49, %v4811_v15 }
 0x872   :  { %v2858_v63 = vsub.f32 %v2701_v50, %v2856_v62 }
 0x874   :  { %v2871_v18 = vrot.slane %v2858_v63, %v4769_v41  ;;  %v2879_v2 = vrot.slane %v2858_v63, %v4772_v42  ;;  %v2867_v3 = vrot.slane %v2858_v63, %v4763_v38  ;;  %v2875_v4 = vrot.slane %v2858_v63, %v4766_v39 }
 0x876   :  { %v2885_v7 = vadd.f32 %v2871_v18, %v2860_v48  ;;  %v2887_v8 = vadd.f32 %v2879_v2, %v2862_v1  ;;  %v2884_v15 = vadd.f32 %v2867_v3, %v2859_v35  ;;  %v2886_v9 = vadd.f32 %v2875_v4, %v2861_v47 }
 0x878   :  { %vm2889_vm12 = vcmp.ge.f32.partialorder %v2885_v7, 0.0  ;;  %v2893_v12 = vmul.f32 0.01, %v2885_v7  ;;  %vm2891_vm13 = vcmp.ge.f32.partialorder %v2887_v8, 0.0  ;;  %v2895_v11 = vmul.f32 0.01, %v2887_v8 }
 0x879   :  { %vm2888_vm14 = vcmp.ge.f32.partialorder %v2884_v15, 0.0  ;;  %v2892_v5 = vmul.f32 0.01, %v2884_v15  ;;  %vm2890_vm15 = vcmp.ge.f32.partialorder %v2886_v9, 0.0  ;;  %v2894_v6 = vmul.f32 0.01, %v2886_v9 }
 0x87a   :  { %v2897_v10 = vsel %vm2889_vm12, %v2885_v7, %v2893_v12  ;;  %v2899_v41 = vsel %vm2891_vm13, %v2887_v8, %v2895_v11 }
 0x87b   :  { %v2966_v13 = vpack.c.bf16 %v2897_v10, %v2897_v10  ;;  %v2968_v42 = vpack.c.bf16 %v2899_v41, %v2899_v41  ;;  %v2896_v14 = vsel %vm2888_vm14, %v2884_v15, %v2892_v5  ;;  %v2898_v38 = vsel %vm2890_vm15, %v2886_v9, %v2894_v6 }
 0x87c   :  { %v2965_v16 = vpack.c.bf16 %v2896_v14, %v2896_v14  ;;  %v2967_v39 = vpack.c.bf16 %v2898_v38, %v2898_v38 }
 0x87d   :  { %3199 = vmatprep.mubr.bf16.mxu0 %v2966_v13  ;;  %3239 = vmatprep.mubr.bf16.mxu1 %v2968_v42 }
 0x87e   :  { %3200 = vmatmul.mubr.bf16.vlgmr.msra.gmra.mxu0 %v2965_v16  ;;  %3240 = vmatmul.mubr.bf16.vlgmr.msra.gmra.mxu1 %v2967_v39 }
 0x87f   :  { %4437 = shalt.err (!%p4434_p0)
}
 0x880   :  { %3260 = dma.vmem_to_hbm [thread:$0]  %s3258_s19, 128, %s4711_s20, [#allocation4]   ;;  %v3531_v22 = vld [vmem:[%s4706_s12] ss:$0 sm:$0xff] }
 0x881   :  { %s4547_s9 = smov [#allocation29]  }
 0x882   :  { %s3267_s23 = sshll.u32 %s4547_s9, 4  ;;  %s3268_s23 = int_to_ptr.vmem [resolvable:$true] %s3267_s23 }
 0x883   :  { %s4446_s20 = scalar_lea.vmem %s3268_s23, 128  ;;  %p4451_p2 = scmp.lt.s32.totalorder %s3268_s23, %s3268_s23 }
 0x884   :  { %p4447_p1 = scmp.ne.s32.totalorder %s3268_s23, %s4446_s20  ;;  %p4452_p3 = scmp.lt.s32.totalorder %s4446_s20, %s4446_s20 }
 0x886   :  { %p4453_p4 = por %p4452_p3, %p4451_p2 }
 0x888   :  { %p4454_p5 = pnand %p4453_p4, %p4447_p1 }
 0x93e   :  { %v3620_v17 = vpop.f32.mrf.mxu0  ;;  %v3642_v21 = vpop.f32.mrf.mxu1 }
 0x940   :  { %v3621_v26 = vpop.f32.mrf.mxu0  ;;  %v3643_v27 = vpop.f32.mrf.mxu1 }
 0x941   :  { %v3622_v28 = vadd.f32 %v3621_v26, %v3620_v17  ;;  %v3644_v23 = vadd.f32 %v3643_v27, %v3642_v21 }
 0x942   :  { %v3623_v29 = vpop.f32.mrf.mxu0  ;;  %v3645_v30 = vpop.f32.mrf.mxu1 }
 0x943   :  { %v3202_v31 = vadd.f32 %v3622_v28, %v3531_v22 }
 0x944   :  { %v3624_v37 = vpop.f32.mrf.mxu0  ;;  %v3646_v32 = vpop.f32.mrf.mxu1 }
 0x945   :  { %v3242_v20 = vadd.f32 %v3644_v23, %v3202_v31 }
 0x947   :  { %v3248_v33 = vmul.f32 0.01, %v3242_v20  ;;  %vm3247_vm0 = vcmp.ge.f32.partialorder %v3242_v20, 0.0 }
 0x949   :  { %v3249_v34 = vsel %vm3247_vm0, %v3242_v20, %v3248_v33 }
 0x94a   :  { %3250 = vst [vmem:[#allocation29] sm:$0xff] %v3249_v34 }
 0x94b   :  { %4457 = shalt.err (!%p4454_p5)
}
 0x94c   :  { %3270 = dma.vmem_to_hbm [thread:$0]  %s3268_s23, 128, %s4716_s27, [#allocation30]  }
 0x94d   :  { %4484 = dma.done.wait [#allocation4], 128  }
 0x94e   :  { %4485 = vsyncadd [#allocation4], 4294967168 }
 0x94f   :  { %4486 = dma.done.wait [#allocation30], 128  }
 0x950   :  { %4487 = vsyncadd [#allocation30], 4294967168 }
 0x951   :  { %3277 = vsyncpa [#allocation3], 1 }
 0x952   :  { %3278 = vsyncpa [#allocation6], 1 }
 0x953   :  { %3279 = vsyncpa [#allocation9], 1 }
 0x954   :  { %3280 = vsyncpa [#allocation12], 1 }
 0x955   :  { %3281 = vsyncpa [#allocation15], 1 }
 0x956   :  { %3282 = vsyncpa [#allocation18], 1 }
 0x957   :  { %3283 = vsyncpa [#allocation21], 1 }
 0x958   :  { %3284 = vsyncpa [#allocation24], 1 }
 0x959   :  { %3285 = vsyncpa [#allocation27], 1 }
 0x95a   :  { %3286 = vsyncpa [#allocation4], 1 }
 0x95b   :  { %3287 = vsyncpa [#allocation30], 1 }

</bundles_post_ra>
